<compile_context>
chip_gen: v6e
topology: v6e:2x2x1
jax: 0.10.0
libtpu: 0.0.40
codegen_flags: <defaults>
</compile_context>

<pallas_src>
import jax
import jax.numpy as jnp
from jax import lax
from jax.experimental import pallas as pl
from jax.experimental.pallas import tpu as pltpu


_SUB = 8  # sublane rows per inner chunk -> one full (8,128) f32 vreg per slab


def mlp_kernel(x_ref, w1_ref, b1_ref, w2_ref, b2_ref, o_ref):
    # x_ref : (F, TBr, 128) VMEM   feature-major, batch on (sublane, lane)
    # w1_ref: (F, H) SMEM          b1_ref: (H,) SMEM
    # w2_ref: (H, O) SMEM          b2_ref: (O,) SMEM
    # o_ref : (O, TBr, 128) VMEM
    F, tbr, _ = x_ref.shape
    H = w1_ref.shape[1]
    O = w2_ref.shape[1]
    n_chunks = tbr // _SUB

    # Negated weights/biases read once as SMEM scalars (scalar ALU has slack);
    # hoisted out of the chunk loop.
    nw1 = [[-w1_ref[k, j] for j in range(H)] for k in range(F)]
    nb1 = [-b1_ref[j] for j in range(H)]
    nw2 = [[-w2_ref[j, i] for i in range(O)] for j in range(H)]
    nb2 = [-b2_ref[i] for i in range(O)]

    def chunk(c, carry):
        r = pl.multiple_of(c * _SUB, _SUB)
        xs = [x_ref[k, pl.ds(r, _SUB), :] for k in range(F)]   # F x (SUB, 128)

        y_neg = [nb2[i] for i in range(O)]                      # -(z2_i)
        for j in range(H):
            # -(z1_j) via FMA chain over the F=4 input rows (bias folded in).
            acc = nb1[j] + nw1[0][j] * xs[0]
            for k in range(1, F):
                acc = acc + nw1[k][j] * xs[k]
            # sigmoid(z1_j) = 1 / (1 + exp(-z1_j)); exp + recip go to EUP.
            hj = pl.reciprocal(1.0 + jnp.exp(acc), approx=True)
            # Fold hidden row into the fc2 accumulators immediately.
            for i in range(O):
                y_neg[i] = y_neg[i] + nw2[j][i] * hj

        out = jnp.stack(
            [pl.reciprocal(1.0 + jnp.exp(y_neg[i]), approx=True)
             for i in range(O)],
            axis=0,
        )                                                       # (O, SUB, 128)
        o_ref[:, pl.ds(r, _SUB), :] = out                       # single write
        return carry

    lax.fori_loop(0, n_chunks, chunk, 0, unroll=min(4, n_chunks))


def _round_up(a, m):
    return (a + m - 1) // m * m


def net_forward(x, w1, b1, w2, b2, *, batch_tile=131072):
    """x: (B, 4) f32 -> (B, 2) f32, matching PyTorch Net.forward semantics."""
    B, F = x.shape
    H = w1.shape[1]
    O = w2.shape[1]

    # Tile is a multiple of 1024 columns (= 8 sublane rows of 128 lanes) so
    # every vreg is fully occupied; large default to amortize per-step
    # overhead, clamped near B to limit padded-tail waste.
    batch_tile = max(1024, _round_up(batch_tile, 1024))
    tb_cols = min(batch_tile, _round_up(B, 1024))
    b_pad = _round_up(B, tb_cols)
    tbr = tb_cols // 128                     # sublane rows per tile (mult of 8)
    grid = (b_pad // tb_cols,)

    # Feature-major, padded (jnp.pad: no zero-fill+scatter pass), then a free
    # row-major reshape to (F, rows, 128). The transpose is imposed by the
    # PyTorch [B, F] contract.
    xT = jnp.pad(x.astype(jnp.float32).T, ((0, 0), (0, b_pad - B)))
    x3 = xT.reshape(F, b_pad // 128, 128)

    o3 = pl.pallas_call(
        mlp_kernel,
        out_shape=jax.ShapeDtypeStruct((O, b_pad // 128, 128), jnp.float32),
        grid=grid,
        in_specs=[
            pl.BlockSpec((F, tbr, 128), lambda i: (0, i, 0)),        # x tile
            pl.BlockSpec(memory_space=pltpu.MemorySpace.SMEM),       # w1
            pl.BlockSpec(memory_space=pltpu.MemorySpace.SMEM),       # b1
            pl.BlockSpec(memory_space=pltpu.MemorySpace.SMEM),       # w2
            pl.BlockSpec(memory_space=pltpu.MemorySpace.SMEM),       # b2
        ],
        out_specs=pl.BlockSpec((O, tbr, 128), lambda i: (0, i, 0)),
        compiler_params=pltpu.CompilerParams(
            dimension_semantics=("parallel",),        # v7x: shard over 2 TCs
            vmem_limit_bytes=32 * 1024 * 1024,        # safe on v7x (64 MiB phys)
        ),
    )(x3, w1.astype(jnp.float32), b1.astype(jnp.float32),
      w2.astype(jnp.float32), b2.astype(jnp.float32))

    # Drop padding and restore the PyTorch [B, 2] contract.
    return o3.reshape(O, b_pad)[:, :B].T


def init_params(key):
    """nn.Linear-style init: U(-1/sqrt(fan_in), +1/sqrt(fan_in)).
    Weights stored as (in_features, out_features) so y = x @ W + b."""
    in1, hidden, out = 4, 12, 2
    k1, k2, k3, k4 = jax.random.split(key, 4)
    lim1 = 1.0 / jnp.sqrt(in1)
    lim2 = 1.0 / jnp.sqrt(hidden)
    w1 = jax.random.uniform(k1, (in1, hidden), jnp.float32, -lim1, lim1)
    b1 = jax.random.uniform(k2, (hidden,), jnp.float32, -lim1, lim1)
    w2 = jax.random.uniform(k3, (hidden, out), jnp.float32, -lim2, lim2)
    b2 = jax.random.uniform(k4, (out,), jnp.float32, -lim2, lim2)
    return w1, b1, w2, b2


if __name__ == "__main__":
    key = jax.random.PRNGKey(0)
    k_x, k_p = jax.random.split(key)
    B = 8
    x = jax.random.normal(k_x, (B, 4), dtype=jnp.float32)
    w1, b1, w2, b2 = init_params(k_p)

    out = net_forward(x, w1, b1, w2, b2)
    jax.block_until_ready(out)

    # Pure-JAX reference; tolerance loosened for the EUP approximate
    # reciprocal used inside the kernel's sigmoid.
    ref = jax.nn.sigmoid(jax.nn.sigmoid(x @ w1 + b1) @ w2 + b2)
    assert out.shape == (B, 2)
    assert jnp.allclose(out, ref, atol=5e-3, rtol=0.0), "mismatch vs reference"

    print("KERNEL_OK")
</pallas_src>

<mosaic_0001>
module attributes {stable_mosaic.version = 11 : i64} {
  func.func @mlp_kernel(%arg0: i32, %arg1: memref<4x8x128xf32, #tpu.memory_space<vmem>>, %arg2: memref<4x12xf32, #tpu.memory_space<smem>>, %arg3: memref<12xf32, #tpu.memory_space<smem>>, %arg4: memref<12x2xf32, #tpu.memory_space<smem>>, %arg5: memref<2xf32, #tpu.memory_space<smem>>, %arg6: memref<2x8x128xf32, #tpu.memory_space<vmem>>) attributes {dimension_semantics = [#tpu.dimension_semantics<parallel>], iteration_bounds = array<i64: 1>, scalar_prefetch = 0 : i64, scratch_operands = 0 : i64, tpu.core_type = #tpu.core_type<tc>, window_params = [{transform_indices = @transform_0, window_bounds = array<i64: 4, 8, 128>}, {transform_indices = @transform_1, window_bounds = array<i64: 4, 12>}, {transform_indices = @transform_2, window_bounds = array<i64: 12>}, {transform_indices = @transform_3, window_bounds = array<i64: 12, 2>}, {transform_indices = @transform_4, window_bounds = array<i64: 2>}, {transform_indices = @transform_5, window_bounds = array<i64: 2, 8, 128>}]} {
    %c0 = arith.constant 0 : index
    %c0_0 = arith.constant 0 : index
    %0 = memref.load %arg2[%c0, %c0_0] : memref<4x12xf32, #tpu.memory_space<smem>>
    %cst = arith.constant 0.000000e+00 : f32
    %1 = arith.subf %cst, %0 : f32
    %c0_1 = arith.constant 0 : index
    %c1 = arith.constant 1 : index
    %2 = memref.load %arg2[%c0_1, %c1] : memref<4x12xf32, #tpu.memory_space<smem>>
    %cst_2 = arith.constant 0.000000e+00 : f32
    %3 = arith.subf %cst_2, %2 : f32
    %c0_3 = arith.constant 0 : index
    %c2 = arith.constant 2 : index
    %4 = memref.load %arg2[%c0_3, %c2] : memref<4x12xf32, #tpu.memory_space<smem>>
    %cst_4 = arith.constant 0.000000e+00 : f32
    %5 = arith.subf %cst_4, %4 : f32
    %c0_5 = arith.constant 0 : index
    %c3 = arith.constant 3 : index
    %6 = memref.load %arg2[%c0_5, %c3] : memref<4x12xf32, #tpu.memory_space<smem>>
    %cst_6 = arith.constant 0.000000e+00 : f32
    %7 = arith.subf %cst_6, %6 : f32
    %c0_7 = arith.constant 0 : index
    %c4 = arith.constant 4 : index
    %8 = memref.load %arg2[%c0_7, %c4] : memref<4x12xf32, #tpu.memory_space<smem>>
    %cst_8 = arith.constant 0.000000e+00 : f32
    %9 = arith.subf %cst_8, %8 : f32
    %c0_9 = arith.constant 0 : index
    %c5 = arith.constant 5 : index
    %10 = memref.load %arg2[%c0_9, %c5] : memref<4x12xf32, #tpu.memory_space<smem>>
    %cst_10 = arith.constant 0.000000e+00 : f32
    %11 = arith.subf %cst_10, %10 : f32
    %c0_11 = arith.constant 0 : index
    %c6 = arith.constant 6 : index
    %12 = memref.load %arg2[%c0_11, %c6] : memref<4x12xf32, #tpu.memory_space<smem>>
    %cst_12 = arith.constant 0.000000e+00 : f32
    %13 = arith.subf %cst_12, %12 : f32
    %c0_13 = arith.constant 0 : index
    %c7 = arith.constant 7 : index
    %14 = memref.load %arg2[%c0_13, %c7] : memref<4x12xf32, #tpu.memory_space<smem>>
    %cst_14 = arith.constant 0.000000e+00 : f32
    %15 = arith.subf %cst_14, %14 : f32
    %c0_15 = arith.constant 0 : index
    %c8 = arith.constant 8 : index
    %16 = memref.load %arg2[%c0_15, %c8] : memref<4x12xf32, #tpu.memory_space<smem>>
    %cst_16 = arith.constant 0.000000e+00 : f32
    %17 = arith.subf %cst_16, %16 : f32
    %c0_17 = arith.constant 0 : index
    %c9 = arith.constant 9 : index
    %18 = memref.load %arg2[%c0_17, %c9] : memref<4x12xf32, #tpu.memory_space<smem>>
    %cst_18 = arith.constant 0.000000e+00 : f32
    %19 = arith.subf %cst_18, %18 : f32
    %c0_19 = arith.constant 0 : index
    %c10 = arith.constant 10 : index
    %20 = memref.load %arg2[%c0_19, %c10] : memref<4x12xf32, #tpu.memory_space<smem>>
    %cst_20 = arith.constant 0.000000e+00 : f32
    %21 = arith.subf %cst_20, %20 : f32
    %c0_21 = arith.constant 0 : index
    %c11 = arith.constant 11 : index
    %22 = memref.load %arg2[%c0_21, %c11] : memref<4x12xf32, #tpu.memory_space<smem>>
    %cst_22 = arith.constant 0.000000e+00 : f32
    %23 = arith.subf %cst_22, %22 : f32
    %c1_23 = arith.constant 1 : index
    %c0_24 = arith.constant 0 : index
    %24 = memref.load %arg2[%c1_23, %c0_24] : memref<4x12xf32, #tpu.memory_space<smem>>
    %cst_25 = arith.constant 0.000000e+00 : f32
    %25 = arith.subf %cst_25, %24 : f32
    %c1_26 = arith.constant 1 : index
    %c1_27 = arith.constant 1 : index
    %26 = memref.load %arg2[%c1_26, %c1_27] : memref<4x12xf32, #tpu.memory_space<smem>>
    %cst_28 = arith.constant 0.000000e+00 : f32
    %27 = arith.subf %cst_28, %26 : f32
    %c1_29 = arith.constant 1 : index
    %c2_30 = arith.constant 2 : index
    %28 = memref.load %arg2[%c1_29, %c2_30] : memref<4x12xf32, #tpu.memory_space<smem>>
    %cst_31 = arith.constant 0.000000e+00 : f32
    %29 = arith.subf %cst_31, %28 : f32
    %c1_32 = arith.constant 1 : index
    %c3_33 = arith.constant 3 : index
    %30 = memref.load %arg2[%c1_32, %c3_33] : memref<4x12xf32, #tpu.memory_space<smem>>
    %cst_34 = arith.constant 0.000000e+00 : f32
    %31 = arith.subf %cst_34, %30 : f32
    %c1_35 = arith.constant 1 : index
    %c4_36 = arith.constant 4 : index
    %32 = memref.load %arg2[%c1_35, %c4_36] : memref<4x12xf32, #tpu.memory_space<smem>>
    %cst_37 = arith.constant 0.000000e+00 : f32
    %33 = arith.subf %cst_37, %32 : f32
    %c1_38 = arith.constant 1 : index
    %c5_39 = arith.constant 5 : index
    %34 = memref.load %arg2[%c1_38, %c5_39] : memref<4x12xf32, #tpu.memory_space<smem>>
    %cst_40 = arith.constant 0.000000e+00 : f32
    %35 = arith.subf %cst_40, %34 : f32
    %c1_41 = arith.constant 1 : index
    %c6_42 = arith.constant 6 : index
    %36 = memref.load %arg2[%c1_41, %c6_42] : memref<4x12xf32, #tpu.memory_space<smem>>
    %cst_43 = arith.constant 0.000000e+00 : f32
    %37 = arith.subf %cst_43, %36 : f32
    %c1_44 = arith.constant 1 : index
    %c7_45 = arith.constant 7 : index
    %38 = memref.load %arg2[%c1_44, %c7_45] : memref<4x12xf32, #tpu.memory_space<smem>>
    %cst_46 = arith.constant 0.000000e+00 : f32
    %39 = arith.subf %cst_46, %38 : f32
    %c1_47 = arith.constant 1 : index
    %c8_48 = arith.constant 8 : index
    %40 = memref.load %arg2[%c1_47, %c8_48] : memref<4x12xf32, #tpu.memory_space<smem>>
    %cst_49 = arith.constant 0.000000e+00 : f32
    %41 = arith.subf %cst_49, %40 : f32
    %c1_50 = arith.constant 1 : index
    %c9_51 = arith.constant 9 : index
    %42 = memref.load %arg2[%c1_50, %c9_51] : memref<4x12xf32, #tpu.memory_space<smem>>
    %cst_52 = arith.constant 0.000000e+00 : f32
    %43 = arith.subf %cst_52, %42 : f32
    %c1_53 = arith.constant 1 : index
    %c10_54 = arith.constant 10 : index
    %44 = memref.load %arg2[%c1_53, %c10_54] : memref<4x12xf32, #tpu.memory_space<smem>>
    %cst_55 = arith.constant 0.000000e+00 : f32
    %45 = arith.subf %cst_55, %44 : f32
    %c1_56 = arith.constant 1 : index
    %c11_57 = arith.constant 11 : index
    %46 = memref.load %arg2[%c1_56, %c11_57] : memref<4x12xf32, #tpu.memory_space<smem>>
    %cst_58 = arith.constant 0.000000e+00 : f32
    %47 = arith.subf %cst_58, %46 : f32
    %c2_59 = arith.constant 2 : index
    %c0_60 = arith.constant 0 : index
    %48 = memref.load %arg2[%c2_59, %c0_60] : memref<4x12xf32, #tpu.memory_space<smem>>
    %cst_61 = arith.constant 0.000000e+00 : f32
    %49 = arith.subf %cst_61, %48 : f32
    %c2_62 = arith.constant 2 : index
    %c1_63 = arith.constant 1 : index
    %50 = memref.load %arg2[%c2_62, %c1_63] : memref<4x12xf32, #tpu.memory_space<smem>>
    %cst_64 = arith.constant 0.000000e+00 : f32
    %51 = arith.subf %cst_64, %50 : f32
    %c2_65 = arith.constant 2 : index
    %c2_66 = arith.constant 2 : index
    %52 = memref.load %arg2[%c2_65, %c2_66] : memref<4x12xf32, #tpu.memory_space<smem>>
    %cst_67 = arith.constant 0.000000e+00 : f32
    %53 = arith.subf %cst_67, %52 : f32
    %c2_68 = arith.constant 2 : index
    %c3_69 = arith.constant 3 : index
    %54 = memref.load %arg2[%c2_68, %c3_69] : memref<4x12xf32, #tpu.memory_space<smem>>
    %cst_70 = arith.constant 0.000000e+00 : f32
    %55 = arith.subf %cst_70, %54 : f32
    %c2_71 = arith.constant 2 : index
    %c4_72 = arith.constant 4 : index
    %56 = memref.load %arg2[%c2_71, %c4_72] : memref<4x12xf32, #tpu.memory_space<smem>>
    %cst_73 = arith.constant 0.000000e+00 : f32
    %57 = arith.subf %cst_73, %56 : f32
    %c2_74 = arith.constant 2 : index
    %c5_75 = arith.constant 5 : index
    %58 = memref.load %arg2[%c2_74, %c5_75] : memref<4x12xf32, #tpu.memory_space<smem>>
    %cst_76 = arith.constant 0.000000e+00 : f32
    %59 = arith.subf %cst_76, %58 : f32
    %c2_77 = arith.constant 2 : index
    %c6_78 = arith.constant 6 : index
    %60 = memref.load %arg2[%c2_77, %c6_78] : memref<4x12xf32, #tpu.memory_space<smem>>
    %cst_79 = arith.constant 0.000000e+00 : f32
    %61 = arith.subf %cst_79, %60 : f32
    %c2_80 = arith.constant 2 : index
    %c7_81 = arith.constant 7 : index
    %62 = memref.load %arg2[%c2_80, %c7_81] : memref<4x12xf32, #tpu.memory_space<smem>>
    %cst_82 = arith.constant 0.000000e+00 : f32
    %63 = arith.subf %cst_82, %62 : f32
    %c2_83 = arith.constant 2 : index
    %c8_84 = arith.constant 8 : index
    %64 = memref.load %arg2[%c2_83, %c8_84] : memref<4x12xf32, #tpu.memory_space<smem>>
    %cst_85 = arith.constant 0.000000e+00 : f32
    %65 = arith.subf %cst_85, %64 : f32
    %c2_86 = arith.constant 2 : index
    %c9_87 = arith.constant 9 : index
    %66 = memref.load %arg2[%c2_86, %c9_87] : memref<4x12xf32, #tpu.memory_space<smem>>
    %cst_88 = arith.constant 0.000000e+00 : f32
    %67 = arith.subf %cst_88, %66 : f32
    %c2_89 = arith.constant 2 : index
    %c10_90 = arith.constant 10 : index
    %68 = memref.load %arg2[%c2_89, %c10_90] : memref<4x12xf32, #tpu.memory_space<smem>>
    %cst_91 = arith.constant 0.000000e+00 : f32
    %69 = arith.subf %cst_91, %68 : f32
    %c2_92 = arith.constant 2 : index
    %c11_93 = arith.constant 11 : index
    %70 = memref.load %arg2[%c2_92, %c11_93] : memref<4x12xf32, #tpu.memory_space<smem>>
    %cst_94 = arith.constant 0.000000e+00 : f32
    %71 = arith.subf %cst_94, %70 : f32
    %c3_95 = arith.constant 3 : index
    %c0_96 = arith.constant 0 : index
    %72 = memref.load %arg2[%c3_95, %c0_96] : memref<4x12xf32, #tpu.memory_space<smem>>
    %cst_97 = arith.constant 0.000000e+00 : f32
    %73 = arith.subf %cst_97, %72 : f32
    %c3_98 = arith.constant 3 : index
    %c1_99 = arith.constant 1 : index
    %74 = memref.load %arg2[%c3_98, %c1_99] : memref<4x12xf32, #tpu.memory_space<smem>>
    %cst_100 = arith.constant 0.000000e+00 : f32
    %75 = arith.subf %cst_100, %74 : f32
    %c3_101 = arith.constant 3 : index
    %c2_102 = arith.constant 2 : index
    %76 = memref.load %arg2[%c3_101, %c2_102] : memref<4x12xf32, #tpu.memory_space<smem>>
    %cst_103 = arith.constant 0.000000e+00 : f32
    %77 = arith.subf %cst_103, %76 : f32
    %c3_104 = arith.constant 3 : index
    %c3_105 = arith.constant 3 : index
    %78 = memref.load %arg2[%c3_104, %c3_105] : memref<4x12xf32, #tpu.memory_space<smem>>
    %cst_106 = arith.constant 0.000000e+00 : f32
    %79 = arith.subf %cst_106, %78 : f32
    %c3_107 = arith.constant 3 : index
    %c4_108 = arith.constant 4 : index
    %80 = memref.load %arg2[%c3_107, %c4_108] : memref<4x12xf32, #tpu.memory_space<smem>>
    %cst_109 = arith.constant 0.000000e+00 : f32
    %81 = arith.subf %cst_109, %80 : f32
    %c3_110 = arith.constant 3 : index
    %c5_111 = arith.constant 5 : index
    %82 = memref.load %arg2[%c3_110, %c5_111] : memref<4x12xf32, #tpu.memory_space<smem>>
    %cst_112 = arith.constant 0.000000e+00 : f32
    %83 = arith.subf %cst_112, %82 : f32
    %c3_113 = arith.constant 3 : index
    %c6_114 = arith.constant 6 : index
    %84 = memref.load %arg2[%c3_113, %c6_114] : memref<4x12xf32, #tpu.memory_space<smem>>
    %cst_115 = arith.constant 0.000000e+00 : f32
    %85 = arith.subf %cst_115, %84 : f32
    %c3_116 = arith.constant 3 : index
    %c7_117 = arith.constant 7 : index
    %86 = memref.load %arg2[%c3_116, %c7_117] : memref<4x12xf32, #tpu.memory_space<smem>>
    %cst_118 = arith.constant 0.000000e+00 : f32
    %87 = arith.subf %cst_118, %86 : f32
    %c3_119 = arith.constant 3 : index
    %c8_120 = arith.constant 8 : index
    %88 = memref.load %arg2[%c3_119, %c8_120] : memref<4x12xf32, #tpu.memory_space<smem>>
    %cst_121 = arith.constant 0.000000e+00 : f32
    %89 = arith.subf %cst_121, %88 : f32
    %c3_122 = arith.constant 3 : index
    %c9_123 = arith.constant 9 : index
    %90 = memref.load %arg2[%c3_122, %c9_123] : memref<4x12xf32, #tpu.memory_space<smem>>
    %cst_124 = arith.constant 0.000000e+00 : f32
    %91 = arith.subf %cst_124, %90 : f32
    %c3_125 = arith.constant 3 : index
    %c10_126 = arith.constant 10 : index
    %92 = memref.load %arg2[%c3_125, %c10_126] : memref<4x12xf32, #tpu.memory_space<smem>>
    %cst_127 = arith.constant 0.000000e+00 : f32
    %93 = arith.subf %cst_127, %92 : f32
    %c3_128 = arith.constant 3 : index
    %c11_129 = arith.constant 11 : index
    %94 = memref.load %arg2[%c3_128, %c11_129] : memref<4x12xf32, #tpu.memory_space<smem>>
    %cst_130 = arith.constant 0.000000e+00 : f32
    %95 = arith.subf %cst_130, %94 : f32
    %c0_131 = arith.constant 0 : index
    %96 = memref.load %arg3[%c0_131] : memref<12xf32, #tpu.memory_space<smem>>
    %cst_132 = arith.constant 0.000000e+00 : f32
    %97 = arith.subf %cst_132, %96 : f32
    %c1_133 = arith.constant 1 : index
    %98 = memref.load %arg3[%c1_133] : memref<12xf32, #tpu.memory_space<smem>>
    %cst_134 = arith.constant 0.000000e+00 : f32
    %99 = arith.subf %cst_134, %98 : f32
    %c2_135 = arith.constant 2 : index
    %100 = memref.load %arg3[%c2_135] : memref<12xf32, #tpu.memory_space<smem>>
    %cst_136 = arith.constant 0.000000e+00 : f32
    %101 = arith.subf %cst_136, %100 : f32
    %c3_137 = arith.constant 3 : index
    %102 = memref.load %arg3[%c3_137] : memref<12xf32, #tpu.memory_space<smem>>
    %cst_138 = arith.constant 0.000000e+00 : f32
    %103 = arith.subf %cst_138, %102 : f32
    %c4_139 = arith.constant 4 : index
    %104 = memref.load %arg3[%c4_139] : memref<12xf32, #tpu.memory_space<smem>>
    %cst_140 = arith.constant 0.000000e+00 : f32
    %105 = arith.subf %cst_140, %104 : f32
    %c5_141 = arith.constant 5 : index
    %106 = memref.load %arg3[%c5_141] : memref<12xf32, #tpu.memory_space<smem>>
    %cst_142 = arith.constant 0.000000e+00 : f32
    %107 = arith.subf %cst_142, %106 : f32
    %c6_143 = arith.constant 6 : index
    %108 = memref.load %arg3[%c6_143] : memref<12xf32, #tpu.memory_space<smem>>
    %cst_144 = arith.constant 0.000000e+00 : f32
    %109 = arith.subf %cst_144, %108 : f32
    %c7_145 = arith.constant 7 : index
    %110 = memref.load %arg3[%c7_145] : memref<12xf32, #tpu.memory_space<smem>>
    %cst_146 = arith.constant 0.000000e+00 : f32
    %111 = arith.subf %cst_146, %110 : f32
    %c8_147 = arith.constant 8 : index
    %112 = memref.load %arg3[%c8_147] : memref<12xf32, #tpu.memory_space<smem>>
    %cst_148 = arith.constant 0.000000e+00 : f32
    %113 = arith.subf %cst_148, %112 : f32
    %c9_149 = arith.constant 9 : index
    %114 = memref.load %arg3[%c9_149] : memref<12xf32, #tpu.memory_space<smem>>
    %cst_150 = arith.constant 0.000000e+00 : f32
    %115 = arith.subf %cst_150, %114 : f32
    %c10_151 = arith.constant 10 : index
    %116 = memref.load %arg3[%c10_151] : memref<12xf32, #tpu.memory_space<smem>>
    %cst_152 = arith.constant 0.000000e+00 : f32
    %117 = arith.subf %cst_152, %116 : f32
    %c11_153 = arith.constant 11 : index
    %118 = memref.load %arg3[%c11_153] : memref<12xf32, #tpu.memory_space<smem>>
    %cst_154 = arith.constant 0.000000e+00 : f32
    %119 = arith.subf %cst_154, %118 : f32
    %c0_155 = arith.constant 0 : index
    %c0_156 = arith.constant 0 : index
    %120 = memref.load %arg4[%c0_155, %c0_156] : memref<12x2xf32, #tpu.memory_space<smem>>
    %cst_157 = arith.constant 0.000000e+00 : f32
    %121 = arith.subf %cst_157, %120 : f32
    %c0_158 = arith.constant 0 : index
    %c1_159 = arith.constant 1 : index
    %122 = memref.load %arg4[%c0_158, %c1_159] : memref<12x2xf32, #tpu.memory_space<smem>>
    %cst_160 = arith.constant 0.000000e+00 : f32
    %123 = arith.subf %cst_160, %122 : f32
    %c1_161 = arith.constant 1 : index
    %c0_162 = arith.constant 0 : index
    %124 = memref.load %arg4[%c1_161, %c0_162] : memref<12x2xf32, #tpu.memory_space<smem>>
    %cst_163 = arith.constant 0.000000e+00 : f32
    %125 = arith.subf %cst_163, %124 : f32
    %c1_164 = arith.constant 1 : index
    %c1_165 = arith.constant 1 : index
    %126 = memref.load %arg4[%c1_164, %c1_165] : memref<12x2xf32, #tpu.memory_space<smem>>
    %cst_166 = arith.constant 0.000000e+00 : f32
    %127 = arith.subf %cst_166, %126 : f32
    %c2_167 = arith.constant 2 : index
    %c0_168 = arith.constant 0 : index
    %128 = memref.load %arg4[%c2_167, %c0_168] : memref<12x2xf32, #tpu.memory_space<smem>>
    %cst_169 = arith.constant 0.000000e+00 : f32
    %129 = arith.subf %cst_169, %128 : f32
    %c2_170 = arith.constant 2 : index
    %c1_171 = arith.constant 1 : index
    %130 = memref.load %arg4[%c2_170, %c1_171] : memref<12x2xf32, #tpu.memory_space<smem>>
    %cst_172 = arith.constant 0.000000e+00 : f32
    %131 = arith.subf %cst_172, %130 : f32
    %c3_173 = arith.constant 3 : index
    %c0_174 = arith.constant 0 : index
    %132 = memref.load %arg4[%c3_173, %c0_174] : memref<12x2xf32, #tpu.memory_space<smem>>
    %cst_175 = arith.constant 0.000000e+00 : f32
    %133 = arith.subf %cst_175, %132 : f32
    %c3_176 = arith.constant 3 : index
    %c1_177 = arith.constant 1 : index
    %134 = memref.load %arg4[%c3_176, %c1_177] : memref<12x2xf32, #tpu.memory_space<smem>>
    %cst_178 = arith.constant 0.000000e+00 : f32
    %135 = arith.subf %cst_178, %134 : f32
    %c4_179 = arith.constant 4 : index
    %c0_180 = arith.constant 0 : index
    %136 = memref.load %arg4[%c4_179, %c0_180] : memref<12x2xf32, #tpu.memory_space<smem>>
    %cst_181 = arith.constant 0.000000e+00 : f32
    %137 = arith.subf %cst_181, %136 : f32
    %c4_182 = arith.constant 4 : index
    %c1_183 = arith.constant 1 : index
    %138 = memref.load %arg4[%c4_182, %c1_183] : memref<12x2xf32, #tpu.memory_space<smem>>
    %cst_184 = arith.constant 0.000000e+00 : f32
    %139 = arith.subf %cst_184, %138 : f32
    %c5_185 = arith.constant 5 : index
    %c0_186 = arith.constant 0 : index
    %140 = memref.load %arg4[%c5_185, %c0_186] : memref<12x2xf32, #tpu.memory_space<smem>>
    %cst_187 = arith.constant 0.000000e+00 : f32
    %141 = arith.subf %cst_187, %140 : f32
    %c5_188 = arith.constant 5 : index
    %c1_189 = arith.constant 1 : index
    %142 = memref.load %arg4[%c5_188, %c1_189] : memref<12x2xf32, #tpu.memory_space<smem>>
    %cst_190 = arith.constant 0.000000e+00 : f32
    %143 = arith.subf %cst_190, %142 : f32
    %c6_191 = arith.constant 6 : index
    %c0_192 = arith.constant 0 : index
    %144 = memref.load %arg4[%c6_191, %c0_192] : memref<12x2xf32, #tpu.memory_space<smem>>
    %cst_193 = arith.constant 0.000000e+00 : f32
    %145 = arith.subf %cst_193, %144 : f32
    %c6_194 = arith.constant 6 : index
    %c1_195 = arith.constant 1 : index
    %146 = memref.load %arg4[%c6_194, %c1_195] : memref<12x2xf32, #tpu.memory_space<smem>>
    %cst_196 = arith.constant 0.000000e+00 : f32
    %147 = arith.subf %cst_196, %146 : f32
    %c7_197 = arith.constant 7 : index
    %c0_198 = arith.constant 0 : index
    %148 = memref.load %arg4[%c7_197, %c0_198] : memref<12x2xf32, #tpu.memory_space<smem>>
    %cst_199 = arith.constant 0.000000e+00 : f32
    %149 = arith.subf %cst_199, %148 : f32
    %c7_200 = arith.constant 7 : index
    %c1_201 = arith.constant 1 : index
    %150 = memref.load %arg4[%c7_200, %c1_201] : memref<12x2xf32, #tpu.memory_space<smem>>
    %cst_202 = arith.constant 0.000000e+00 : f32
    %151 = arith.subf %cst_202, %150 : f32
    %c8_203 = arith.constant 8 : index
    %c0_204 = arith.constant 0 : index
    %152 = memref.load %arg4[%c8_203, %c0_204] : memref<12x2xf32, #tpu.memory_space<smem>>
    %cst_205 = arith.constant 0.000000e+00 : f32
    %153 = arith.subf %cst_205, %152 : f32
    %c8_206 = arith.constant 8 : index
    %c1_207 = arith.constant 1 : index
    %154 = memref.load %arg4[%c8_206, %c1_207] : memref<12x2xf32, #tpu.memory_space<smem>>
    %cst_208 = arith.constant 0.000000e+00 : f32
    %155 = arith.subf %cst_208, %154 : f32
    %c9_209 = arith.constant 9 : index
    %c0_210 = arith.constant 0 : index
    %156 = memref.load %arg4[%c9_209, %c0_210] : memref<12x2xf32, #tpu.memory_space<smem>>
    %cst_211 = arith.constant 0.000000e+00 : f32
    %157 = arith.subf %cst_211, %156 : f32
    %c9_212 = arith.constant 9 : index
    %c1_213 = arith.constant 1 : index
    %158 = memref.load %arg4[%c9_212, %c1_213] : memref<12x2xf32, #tpu.memory_space<smem>>
    %cst_214 = arith.constant 0.000000e+00 : f32
    %159 = arith.subf %cst_214, %158 : f32
    %c10_215 = arith.constant 10 : index
    %c0_216 = arith.constant 0 : index
    %160 = memref.load %arg4[%c10_215, %c0_216] : memref<12x2xf32, #tpu.memory_space<smem>>
    %cst_217 = arith.constant 0.000000e+00 : f32
    %161 = arith.subf %cst_217, %160 : f32
    %c10_218 = arith.constant 10 : index
    %c1_219 = arith.constant 1 : index
    %162 = memref.load %arg4[%c10_218, %c1_219] : memref<12x2xf32, #tpu.memory_space<smem>>
    %cst_220 = arith.constant 0.000000e+00 : f32
    %163 = arith.subf %cst_220, %162 : f32
    %c11_221 = arith.constant 11 : index
    %c0_222 = arith.constant 0 : index
    %164 = memref.load %arg4[%c11_221, %c0_222] : memref<12x2xf32, #tpu.memory_space<smem>>
    %cst_223 = arith.constant 0.000000e+00 : f32
    %165 = arith.subf %cst_223, %164 : f32
    %c11_224 = arith.constant 11 : index
    %c1_225 = arith.constant 1 : index
    %166 = memref.load %arg4[%c11_224, %c1_225] : memref<12x2xf32, #tpu.memory_space<smem>>
    %cst_226 = arith.constant 0.000000e+00 : f32
    %167 = arith.subf %cst_226, %166 : f32
    %c0_227 = arith.constant 0 : index
    %168 = memref.load %arg5[%c0_227] : memref<2xf32, #tpu.memory_space<smem>>
    %cst_228 = arith.constant 0.000000e+00 : f32
    %169 = arith.subf %cst_228, %168 : f32
    %c1_229 = arith.constant 1 : index
    %170 = memref.load %arg5[%c1_229] : memref<2xf32, #tpu.memory_space<smem>>
    %cst_230 = arith.constant 0.000000e+00 : f32
    %171 = arith.subf %cst_230, %170 : f32
    %c0_i32 = arith.constant 0 : i32
    %c8_i32 = arith.constant 8 : i32
    %172 = arith.muli %c0_i32, %c8_i32 : i32
    %173 = tpu.assume_multiple %172, 8 : i32
    %c0_231 = arith.constant 0 : index
    %174 = arith.index_cast %173 : i32 to index
    %c0_232 = arith.constant 0 : index
    %175 = vector.load %arg1[%c0_231, %174, %c0_232] : memref<4x8x128xf32, #tpu.memory_space<vmem>>, vector<1x8x128xf32>
    %176 = vector.shape_cast %175 : vector<1x8x128xf32> to vector<8x128xf32>
    %c1_233 = arith.constant 1 : index
    %177 = arith.index_cast %173 : i32 to index
    %c0_234 = arith.constant 0 : index
    %178 = vector.load %arg1[%c1_233, %177, %c0_234] : memref<4x8x128xf32, #tpu.memory_space<vmem>>, vector<1x8x128xf32>
    %179 = vector.shape_cast %178 : vector<1x8x128xf32> to vector<8x128xf32>
    %c2_235 = arith.constant 2 : index
    %180 = arith.index_cast %173 : i32 to index
    %c0_236 = arith.constant 0 : index
    %181 = vector.load %arg1[%c2_235, %180, %c0_236] : memref<4x8x128xf32, #tpu.memory_space<vmem>>, vector<1x8x128xf32>
    %182 = vector.shape_cast %181 : vector<1x8x128xf32> to vector<8x128xf32>
    %c3_237 = arith.constant 3 : index
    %183 = arith.index_cast %173 : i32 to index
    %c0_238 = arith.constant 0 : index
    %184 = vector.load %arg1[%c3_237, %183, %c0_238] : memref<4x8x128xf32, #tpu.memory_space<vmem>>, vector<1x8x128xf32>
    %185 = vector.shape_cast %184 : vector<1x8x128xf32> to vector<8x128xf32>
    %186 = vector.broadcast %1 : f32 to vector<8x128xf32>
    %187 = arith.mulf %186, %176 : vector<8x128xf32>
    %188 = vector.broadcast %97 : f32 to vector<8x128xf32>
    %189 = arith.addf %188, %187 : vector<8x128xf32>
    %190 = vector.broadcast %25 : f32 to vector<8x128xf32>
    %191 = arith.mulf %190, %179 : vector<8x128xf32>
    %192 = arith.addf %189, %191 : vector<8x128xf32>
    %193 = vector.broadcast %49 : f32 to vector<8x128xf32>
    %194 = arith.mulf %193, %182 : vector<8x128xf32>
    %195 = arith.addf %192, %194 : vector<8x128xf32>
    %196 = vector.broadcast %73 : f32 to vector<8x128xf32>
    %197 = arith.mulf %196, %185 : vector<8x128xf32>
    %198 = arith.addf %195, %197 : vector<8x128xf32>
    %199 = math.exp %198 : vector<8x128xf32>
    %cst_239 = arith.constant 1.000000e+00 : f32
    %200 = vector.broadcast %cst_239 : f32 to vector<8x128xf32>
    %201 = arith.addf %200, %199 : vector<8x128xf32>
    %202 = tpu.reciprocal %201 {approx = true} : vector<8x128xf32> -> vector<8x128xf32>
    %203 = vector.broadcast %121 : f32 to vector<8x128xf32>
    %204 = arith.mulf %203, %202 : vector<8x128xf32>
    %205 = vector.broadcast %169 : f32 to vector<8x128xf32>
    %206 = arith.addf %205, %204 : vector<8x128xf32>
    %207 = vector.broadcast %123 : f32 to vector<8x128xf32>
    %208 = arith.mulf %207, %202 : vector<8x128xf32>
    %209 = vector.broadcast %171 : f32 to vector<8x128xf32>
    %210 = arith.addf %209, %208 : vector<8x128xf32>
    %211 = vector.broadcast %3 : f32 to vector<8x128xf32>
    %212 = arith.mulf %211, %176 : vector<8x128xf32>
    %213 = vector.broadcast %99 : f32 to vector<8x128xf32>
    %214 = arith.addf %213, %212 : vector<8x128xf32>
    %215 = vector.broadcast %27 : f32 to vector<8x128xf32>
    %216 = arith.mulf %215, %179 : vector<8x128xf32>
    %217 = arith.addf %214, %216 : vector<8x128xf32>
    %218 = vector.broadcast %51 : f32 to vector<8x128xf32>
    %219 = arith.mulf %218, %182 : vector<8x128xf32>
    %220 = arith.addf %217, %219 : vector<8x128xf32>
    %221 = vector.broadcast %75 : f32 to vector<8x128xf32>
    %222 = arith.mulf %221, %185 : vector<8x128xf32>
    %223 = arith.addf %220, %222 : vector<8x128xf32>
    %224 = math.exp %223 : vector<8x128xf32>
    %cst_240 = arith.constant 1.000000e+00 : f32
    %225 = vector.broadcast %cst_240 : f32 to vector<8x128xf32>
    %226 = arith.addf %225, %224 : vector<8x128xf32>
    %227 = tpu.reciprocal %226 {approx = true} : vector<8x128xf32> -> vector<8x128xf32>
    %228 = vector.broadcast %125 : f32 to vector<8x128xf32>
    %229 = arith.mulf %228, %227 : vector<8x128xf32>
    %230 = arith.addf %206, %229 : vector<8x128xf32>
    %231 = vector.broadcast %127 : f32 to vector<8x128xf32>
    %232 = arith.mulf %231, %227 : vector<8x128xf32>
    %233 = arith.addf %210, %232 : vector<8x128xf32>
    %234 = vector.broadcast %5 : f32 to vector<8x128xf32>
    %235 = arith.mulf %234, %176 : vector<8x128xf32>
    %236 = vector.broadcast %101 : f32 to vector<8x128xf32>
    %237 = arith.addf %236, %235 : vector<8x128xf32>
    %238 = vector.broadcast %29 : f32 to vector<8x128xf32>
    %239 = arith.mulf %238, %179 : vector<8x128xf32>
    %240 = arith.addf %237, %239 : vector<8x128xf32>
    %241 = vector.broadcast %53 : f32 to vector<8x128xf32>
    %242 = arith.mulf %241, %182 : vector<8x128xf32>
    %243 = arith.addf %240, %242 : vector<8x128xf32>
    %244 = vector.broadcast %77 : f32 to vector<8x128xf32>
    %245 = arith.mulf %244, %185 : vector<8x128xf32>
    %246 = arith.addf %243, %245 : vector<8x128xf32>
    %247 = math.exp %246 : vector<8x128xf32>
    %cst_241 = arith.constant 1.000000e+00 : f32
    %248 = vector.broadcast %cst_241 : f32 to vector<8x128xf32>
    %249 = arith.addf %248, %247 : vector<8x128xf32>
    %250 = tpu.reciprocal %249 {approx = true} : vector<8x128xf32> -> vector<8x128xf32>
    %251 = vector.broadcast %129 : f32 to vector<8x128xf32>
    %252 = arith.mulf %251, %250 : vector<8x128xf32>
    %253 = arith.addf %230, %252 : vector<8x128xf32>
    %254 = vector.broadcast %131 : f32 to vector<8x128xf32>
    %255 = arith.mulf %254, %250 : vector<8x128xf32>
    %256 = arith.addf %233, %255 : vector<8x128xf32>
    %257 = vector.broadcast %7 : f32 to vector<8x128xf32>
    %258 = arith.mulf %257, %176 : vector<8x128xf32>
    %259 = vector.broadcast %103 : f32 to vector<8x128xf32>
    %260 = arith.addf %259, %258 : vector<8x128xf32>
    %261 = vector.broadcast %31 : f32 to vector<8x128xf32>
    %262 = arith.mulf %261, %179 : vector<8x128xf32>
    %263 = arith.addf %260, %262 : vector<8x128xf32>
    %264 = vector.broadcast %55 : f32 to vector<8x128xf32>
    %265 = arith.mulf %264, %182 : vector<8x128xf32>
    %266 = arith.addf %263, %265 : vector<8x128xf32>
    %267 = vector.broadcast %79 : f32 to vector<8x128xf32>
    %268 = arith.mulf %267, %185 : vector<8x128xf32>
    %269 = arith.addf %266, %268 : vector<8x128xf32>
    %270 = math.exp %269 : vector<8x128xf32>
    %cst_242 = arith.constant 1.000000e+00 : f32
    %271 = vector.broadcast %cst_242 : f32 to vector<8x128xf32>
    %272 = arith.addf %271, %270 : vector<8x128xf32>
    %273 = tpu.reciprocal %272 {approx = true} : vector<8x128xf32> -> vector<8x128xf32>
    %274 = vector.broadcast %133 : f32 to vector<8x128xf32>
    %275 = arith.mulf %274, %273 : vector<8x128xf32>
    %276 = arith.addf %253, %275 : vector<8x128xf32>
    %277 = vector.broadcast %135 : f32 to vector<8x128xf32>
    %278 = arith.mulf %277, %273 : vector<8x128xf32>
    %279 = arith.addf %256, %278 : vector<8x128xf32>
    %280 = vector.broadcast %9 : f32 to vector<8x128xf32>
    %281 = arith.mulf %280, %176 : vector<8x128xf32>
    %282 = vector.broadcast %105 : f32 to vector<8x128xf32>
    %283 = arith.addf %282, %281 : vector<8x128xf32>
    %284 = vector.broadcast %33 : f32 to vector<8x128xf32>
    %285 = arith.mulf %284, %179 : vector<8x128xf32>
    %286 = arith.addf %283, %285 : vector<8x128xf32>
    %287 = vector.broadcast %57 : f32 to vector<8x128xf32>
    %288 = arith.mulf %287, %182 : vector<8x128xf32>
    %289 = arith.addf %286, %288 : vector<8x128xf32>
    %290 = vector.broadcast %81 : f32 to vector<8x128xf32>
    %291 = arith.mulf %290, %185 : vector<8x128xf32>
    %292 = arith.addf %289, %291 : vector<8x128xf32>
    %293 = math.exp %292 : vector<8x128xf32>
    %cst_243 = arith.constant 1.000000e+00 : f32
    %294 = vector.broadcast %cst_243 : f32 to vector<8x128xf32>
    %295 = arith.addf %294, %293 : vector<8x128xf32>
    %296 = tpu.reciprocal %295 {approx = true} : vector<8x128xf32> -> vector<8x128xf32>
    %297 = vector.broadcast %137 : f32 to vector<8x128xf32>
    %298 = arith.mulf %297, %296 : vector<8x128xf32>
    %299 = arith.addf %276, %298 : vector<8x128xf32>
    %300 = vector.broadcast %139 : f32 to vector<8x128xf32>
    %301 = arith.mulf %300, %296 : vector<8x128xf32>
    %302 = arith.addf %279, %301 : vector<8x128xf32>
    %303 = vector.broadcast %11 : f32 to vector<8x128xf32>
    %304 = arith.mulf %303, %176 : vector<8x128xf32>
    %305 = vector.broadcast %107 : f32 to vector<8x128xf32>
    %306 = arith.addf %305, %304 : vector<8x128xf32>
    %307 = vector.broadcast %35 : f32 to vector<8x128xf32>
    %308 = arith.mulf %307, %179 : vector<8x128xf32>
    %309 = arith.addf %306, %308 : vector<8x128xf32>
    %310 = vector.broadcast %59 : f32 to vector<8x128xf32>
    %311 = arith.mulf %310, %182 : vector<8x128xf32>
    %312 = arith.addf %309, %311 : vector<8x128xf32>
    %313 = vector.broadcast %83 : f32 to vector<8x128xf32>
    %314 = arith.mulf %313, %185 : vector<8x128xf32>
    %315 = arith.addf %312, %314 : vector<8x128xf32>
    %316 = math.exp %315 : vector<8x128xf32>
    %cst_244 = arith.constant 1.000000e+00 : f32
    %317 = vector.broadcast %cst_244 : f32 to vector<8x128xf32>
    %318 = arith.addf %317, %316 : vector<8x128xf32>
    %319 = tpu.reciprocal %318 {approx = true} : vector<8x128xf32> -> vector<8x128xf32>
    %320 = vector.broadcast %141 : f32 to vector<8x128xf32>
    %321 = arith.mulf %320, %319 : vector<8x128xf32>
    %322 = arith.addf %299, %321 : vector<8x128xf32>
    %323 = vector.broadcast %143 : f32 to vector<8x128xf32>
    %324 = arith.mulf %323, %319 : vector<8x128xf32>
    %325 = arith.addf %302, %324 : vector<8x128xf32>
    %326 = vector.broadcast %13 : f32 to vector<8x128xf32>
    %327 = arith.mulf %326, %176 : vector<8x128xf32>
    %328 = vector.broadcast %109 : f32 to vector<8x128xf32>
    %329 = arith.addf %328, %327 : vector<8x128xf32>
    %330 = vector.broadcast %37 : f32 to vector<8x128xf32>
    %331 = arith.mulf %330, %179 : vector<8x128xf32>
    %332 = arith.addf %329, %331 : vector<8x128xf32>
    %333 = vector.broadcast %61 : f32 to vector<8x128xf32>
    %334 = arith.mulf %333, %182 : vector<8x128xf32>
    %335 = arith.addf %332, %334 : vector<8x128xf32>
    %336 = vector.broadcast %85 : f32 to vector<8x128xf32>
    %337 = arith.mulf %336, %185 : vector<8x128xf32>
    %338 = arith.addf %335, %337 : vector<8x128xf32>
    %339 = math.exp %338 : vector<8x128xf32>
    %cst_245 = arith.constant 1.000000e+00 : f32
    %340 = vector.broadcast %cst_245 : f32 to vector<8x128xf32>
    %341 = arith.addf %340, %339 : vector<8x128xf32>
    %342 = tpu.reciprocal %341 {approx = true} : vector<8x128xf32> -> vector<8x128xf32>
    %343 = vector.broadcast %145 : f32 to vector<8x128xf32>
    %344 = arith.mulf %343, %342 : vector<8x128xf32>
    %345 = arith.addf %322, %344 : vector<8x128xf32>
    %346 = vector.broadcast %147 : f32 to vector<8x128xf32>
    %347 = arith.mulf %346, %342 : vector<8x128xf32>
    %348 = arith.addf %325, %347 : vector<8x128xf32>
    %349 = vector.broadcast %15 : f32 to vector<8x128xf32>
    %350 = arith.mulf %349, %176 : vector<8x128xf32>
    %351 = vector.broadcast %111 : f32 to vector<8x128xf32>
    %352 = arith.addf %351, %350 : vector<8x128xf32>
    %353 = vector.broadcast %39 : f32 to vector<8x128xf32>
    %354 = arith.mulf %353, %179 : vector<8x128xf32>
    %355 = arith.addf %352, %354 : vector<8x128xf32>
    %356 = vector.broadcast %63 : f32 to vector<8x128xf32>
    %357 = arith.mulf %356, %182 : vector<8x128xf32>
    %358 = arith.addf %355, %357 : vector<8x128xf32>
    %359 = vector.broadcast %87 : f32 to vector<8x128xf32>
    %360 = arith.mulf %359, %185 : vector<8x128xf32>
    %361 = arith.addf %358, %360 : vector<8x128xf32>
    %362 = math.exp %361 : vector<8x128xf32>
    %cst_246 = arith.constant 1.000000e+00 : f32
    %363 = vector.broadcast %cst_246 : f32 to vector<8x128xf32>
    %364 = arith.addf %363, %362 : vector<8x128xf32>
    %365 = tpu.reciprocal %364 {approx = true} : vector<8x128xf32> -> vector<8x128xf32>
    %366 = vector.broadcast %149 : f32 to vector<8x128xf32>
    %367 = arith.mulf %366, %365 : vector<8x128xf32>
    %368 = arith.addf %345, %367 : vector<8x128xf32>
    %369 = vector.broadcast %151 : f32 to vector<8x128xf32>
    %370 = arith.mulf %369, %365 : vector<8x128xf32>
    %371 = arith.addf %348, %370 : vector<8x128xf32>
    %372 = vector.broadcast %17 : f32 to vector<8x128xf32>
    %373 = arith.mulf %372, %176 : vector<8x128xf32>
    %374 = vector.broadcast %113 : f32 to vector<8x128xf32>
    %375 = arith.addf %374, %373 : vector<8x128xf32>
    %376 = vector.broadcast %41 : f32 to vector<8x128xf32>
    %377 = arith.mulf %376, %179 : vector<8x128xf32>
    %378 = arith.addf %375, %377 : vector<8x128xf32>
    %379 = vector.broadcast %65 : f32 to vector<8x128xf32>
    %380 = arith.mulf %379, %182 : vector<8x128xf32>
    %381 = arith.addf %378, %380 : vector<8x128xf32>
    %382 = vector.broadcast %89 : f32 to vector<8x128xf32>
    %383 = arith.mulf %382, %185 : vector<8x128xf32>
    %384 = arith.addf %381, %383 : vector<8x128xf32>
    %385 = math.exp %384 : vector<8x128xf32>
    %cst_247 = arith.constant 1.000000e+00 : f32
    %386 = vector.broadcast %cst_247 : f32 to vector<8x128xf32>
    %387 = arith.addf %386, %385 : vector<8x128xf32>
    %388 = tpu.reciprocal %387 {approx = true} : vector<8x128xf32> -> vector<8x128xf32>
    %389 = vector.broadcast %153 : f32 to vector<8x128xf32>
    %390 = arith.mulf %389, %388 : vector<8x128xf32>
    %391 = arith.addf %368, %390 : vector<8x128xf32>
    %392 = vector.broadcast %155 : f32 to vector<8x128xf32>
    %393 = arith.mulf %392, %388 : vector<8x128xf32>
    %394 = arith.addf %371, %393 : vector<8x128xf32>
    %395 = vector.broadcast %19 : f32 to vector<8x128xf32>
    %396 = arith.mulf %395, %176 : vector<8x128xf32>
    %397 = vector.broadcast %115 : f32 to vector<8x128xf32>
    %398 = arith.addf %397, %396 : vector<8x128xf32>
    %399 = vector.broadcast %43 : f32 to vector<8x128xf32>
    %400 = arith.mulf %399, %179 : vector<8x128xf32>
    %401 = arith.addf %398, %400 : vector<8x128xf32>
    %402 = vector.broadcast %67 : f32 to vector<8x128xf32>
    %403 = arith.mulf %402, %182 : vector<8x128xf32>
    %404 = arith.addf %401, %403 : vector<8x128xf32>
    %405 = vector.broadcast %91 : f32 to vector<8x128xf32>
    %406 = arith.mulf %405, %185 : vector<8x128xf32>
    %407 = arith.addf %404, %406 : vector<8x128xf32>
    %408 = math.exp %407 : vector<8x128xf32>
    %cst_248 = arith.constant 1.000000e+00 : f32
    %409 = vector.broadcast %cst_248 : f32 to vector<8x128xf32>
    %410 = arith.addf %409, %408 : vector<8x128xf32>
    %411 = tpu.reciprocal %410 {approx = true} : vector<8x128xf32> -> vector<8x128xf32>
    %412 = vector.broadcast %157 : f32 to vector<8x128xf32>
    %413 = arith.mulf %412, %411 : vector<8x128xf32>
    %414 = arith.addf %391, %413 : vector<8x128xf32>
    %415 = vector.broadcast %159 : f32 to vector<8x128xf32>
    %416 = arith.mulf %415, %411 : vector<8x128xf32>
    %417 = arith.addf %394, %416 : vector<8x128xf32>
    %418 = vector.broadcast %21 : f32 to vector<8x128xf32>
    %419 = arith.mulf %418, %176 : vector<8x128xf32>
    %420 = vector.broadcast %117 : f32 to vector<8x128xf32>
    %421 = arith.addf %420, %419 : vector<8x128xf32>
    %422 = vector.broadcast %45 : f32 to vector<8x128xf32>
    %423 = arith.mulf %422, %179 : vector<8x128xf32>
    %424 = arith.addf %421, %423 : vector<8x128xf32>
    %425 = vector.broadcast %69 : f32 to vector<8x128xf32>
    %426 = arith.mulf %425, %182 : vector<8x128xf32>
    %427 = arith.addf %424, %426 : vector<8x128xf32>
    %428 = vector.broadcast %93 : f32 to vector<8x128xf32>
    %429 = arith.mulf %428, %185 : vector<8x128xf32>
    %430 = arith.addf %427, %429 : vector<8x128xf32>
    %431 = math.exp %430 : vector<8x128xf32>
    %cst_249 = arith.constant 1.000000e+00 : f32
    %432 = vector.broadcast %cst_249 : f32 to vector<8x128xf32>
    %433 = arith.addf %432, %431 : vector<8x128xf32>
    %434 = tpu.reciprocal %433 {approx = true} : vector<8x128xf32> -> vector<8x128xf32>
    %435 = vector.broadcast %161 : f32 to vector<8x128xf32>
    %436 = arith.mulf %435, %434 : vector<8x128xf32>
    %437 = arith.addf %414, %436 : vector<8x128xf32>
    %438 = vector.broadcast %163 : f32 to vector<8x128xf32>
    %439 = arith.mulf %438, %434 : vector<8x128xf32>
    %440 = arith.addf %417, %439 : vector<8x128xf32>
    %441 = vector.broadcast %23 : f32 to vector<8x128xf32>
    %442 = arith.mulf %441, %176 : vector<8x128xf32>
    %443 = vector.broadcast %119 : f32 to vector<8x128xf32>
    %444 = arith.addf %443, %442 : vector<8x128xf32>
    %445 = vector.broadcast %47 : f32 to vector<8x128xf32>
    %446 = arith.mulf %445, %179 : vector<8x128xf32>
    %447 = arith.addf %444, %446 : vector<8x128xf32>
    %448 = vector.broadcast %71 : f32 to vector<8x128xf32>
    %449 = arith.mulf %448, %182 : vector<8x128xf32>
    %450 = arith.addf %447, %449 : vector<8x128xf32>
    %451 = vector.broadcast %95 : f32 to vector<8x128xf32>
    %452 = arith.mulf %451, %185 : vector<8x128xf32>
    %453 = arith.addf %450, %452 : vector<8x128xf32>
    %454 = math.exp %453 : vector<8x128xf32>
    %cst_250 = arith.constant 1.000000e+00 : f32
    %455 = vector.broadcast %cst_250 : f32 to vector<8x128xf32>
    %456 = arith.addf %455, %454 : vector<8x128xf32>
    %457 = tpu.reciprocal %456 {approx = true} : vector<8x128xf32> -> vector<8x128xf32>
    %458 = vector.broadcast %165 : f32 to vector<8x128xf32>
    %459 = arith.mulf %458, %457 : vector<8x128xf32>
    %460 = arith.addf %437, %459 : vector<8x128xf32>
    %461 = vector.broadcast %167 : f32 to vector<8x128xf32>
    %462 = arith.mulf %461, %457 : vector<8x128xf32>
    %463 = arith.addf %440, %462 : vector<8x128xf32>
    %464 = math.exp %460 : vector<8x128xf32>
    %cst_251 = arith.constant 1.000000e+00 : f32
    %465 = vector.broadcast %cst_251 : f32 to vector<8x128xf32>
    %466 = arith.addf %465, %464 : vector<8x128xf32>
    %467 = tpu.reciprocal %466 {approx = true} : vector<8x128xf32> -> vector<8x128xf32>
    %468 = math.exp %463 : vector<8x128xf32>
    %cst_252 = arith.constant 1.000000e+00 : f32
    %469 = vector.broadcast %cst_252 : f32 to vector<8x128xf32>
    %470 = arith.addf %469, %468 : vector<8x128xf32>
    %471 = tpu.reciprocal %470 {approx = true} : vector<8x128xf32> -> vector<8x128xf32>
    %472 = vector.shape_cast %467 : vector<8x128xf32> to vector<1x8x128xf32>
    %473 = vector.shape_cast %471 : vector<8x128xf32> to vector<1x8x128xf32>
    %474 = tpu.concatenate %472, %473 in 0 : vector<1x8x128xf32>, vector<1x8x128xf32> -> vector<2x8x128xf32>
    %c0_253 = arith.constant 0 : index
    %475 = arith.index_cast %173 : i32 to index
    %c0_254 = arith.constant 0 : index
    %476 = vector.load %arg6[%c0_253, %475, %c0_254] : memref<2x8x128xf32, #tpu.memory_space<vmem>>, vector<2x8x128xf32>
    tpu.vector_store %arg6[%c0_253, %475, %c0_254], %474 {strides = array<i32>} : memref<2x8x128xf32, #tpu.memory_space<vmem>>, vector<2x8x128xf32>,
    %c1_i32 = arith.constant 1 : i32
    return
  }
  func.func @transform_0(%arg0: i32) -> (i32, i32, i32) {
    %c0_i32 = arith.constant 0 : i32
    %c0_i32_0 = arith.constant 0 : i32
    %c0_i32_1 = arith.constant 0 : i32
    return %c0_i32, %arg0, %c0_i32_0 : i32, i32, i32
  }
  func.func @transform_1(%arg0: i32) -> (i32, i32) {
    %c0_i32 = arith.constant 0 : i32
    %c0_i32_0 = arith.constant 0 : i32
    %c0_i32_1 = arith.constant 0 : i32
    return %c0_i32, %c0_i32_0 : i32, i32
  }
  func.func @transform_2(%arg0: i32) -> i32 {
    %c0_i32 = arith.constant 0 : i32
    %c0_i32_0 = arith.constant 0 : i32
    return %c0_i32 : i32
  }
  func.func @transform_3(%arg0: i32) -> (i32, i32) {
    %c0_i32 = arith.constant 0 : i32
    %c0_i32_0 = arith.constant 0 : i32
    %c0_i32_1 = arith.constant 0 : i32
    return %c0_i32, %c0_i32_0 : i32, i32
  }
  func.func @transform_4(%arg0: i32) -> i32 {
    %c0_i32 = arith.constant 0 : i32
    %c0_i32_0 = arith.constant 0 : i32
    return %c0_i32 : i32
  }
  func.func @transform_5(%arg0: i32) -> (i32, i32, i32) {
    %c0_i32 = arith.constant 0 : i32
    %c0_i32_0 = arith.constant 0 : i32
    %c0_i32_1 = arith.constant 0 : i32
    return %c0_i32, %arg0, %c0_i32_0 : i32, i32, i32
  }
}

</mosaic_0001>

<bundles_post_ra>
// kernel: tpu_custom_call.1
= control target key start
LH: loop header
LB: loop body
LE: loop exit
PB: predicated region body
PF: predicated region fallthrough
CT: control target
= control target key end

     0   :  { %s1367_s0 = inlined_call_operand.hbm [shape: f32[4,8,128], index: 0, kind: input, shape index: {}]   ;;  %s1368_s1 = inlined_call_operand.vmem [shape: f32[4,12], index: 1, kind: input, shape index: {}]   ;;  %s1369_s2 = inlined_call_operand.vmem [shape: f32[12], index: 2, kind: input, shape index: {}]   ;;  %s1370_s3 = inlined_call_operand.vmem [shape: f32[12,2], index: 3, kind: input, shape index: {}]   ;;  %s1371_s4 = inlined_call_operand.vmem [shape: f32[2], index: 4, kind: input, shape index: {}]   ;;  %s1372_s5 = inlined_call_operand.hbm [shape: f32[2,8,128], index: 5, kind: output, shape index: {}]  }
   0x1   :  { %1398 = sst [smem:[#allocation43_spill]] %s1372_s5 }
   0x2   :  { %10 = vsyncpa [#allocation3], 0 }
   0x3   :  { %11 = vsyncpa [#allocation5], 0 }
   0x4   :  { %12 = vsyncpa [#allocation8], 0 }
   0x5   :  { %13 = vsyncpa [#allocation11], 0  ;;  %s43_s20 = sshll.u32 %s1369_s2, 4  ;;  %s44_s20 = int_to_ptr.vmem [resolvable:$true] %s43_s20 }
   0x6   :  { %14 = vsyncpa [#allocation4], 0  ;;  %s724_s21 = scalar_lea.vmem %s44_s20, 16  ;;  %p729_p1 = scmp.lt.s32.totalorder %s44_s20, %s44_s20 }
   0x7   :  { %p725_p0 = scmp.ne.s32.totalorder %s44_s20, %s724_s21  ;;  %p730_p2 = scmp.lt.s32.totalorder %s724_s21, %s724_s21 }
   0x9   :  { %p731_p3 = por %p730_p2, %p729_p1 }
   0xb   :  { %p732_p4 = pnand %p731_p3, %p725_p0 }
   0xd   :  { %735 = shalt.err (!%p732_p4)
}
   0xe   :  { %s822_s22 = smov [#allocation7]   ;;  %s823_s23 = smov [#allocation2]  }
   0xf   :  { %46 = dma.vmem_to_smem %s44_s20, 16, %s822_s22, [#allocation8]  }
  0x10   :  { %s20_s24 = sshll.u32 %s823_s23, 4  ;;  %s21_s24 = int_to_ptr.vmem [resolvable:$true] %s20_s24 }
  0x11   :  { %s744_s25 = scalar_lea.vmem %s21_s24, 512  ;;  %p749_p6 = scmp.lt.s32.totalorder %s21_s24, %s21_s24 }
  0x12   :  { %p745_p5 = scmp.ne.s32.totalorder %s21_s24, %s744_s25  ;;  %p750_p7 = scmp.lt.s32.totalorder %s744_s25, %s744_s25 }
  0x14   :  { %p751_p8 = por %p750_p7, %p749_p6 }
  0x16   :  { %p752_p9 = pnand %p751_p8, %p745_p5 }
  0x18   :  { %755 = shalt.err (!%p752_p9)
}
  0x19   :  { %s1373_s2 = smov 128   ;;  %s1374_s26 = smov 8  }
  0x1a   :  { %26 = dma.hbm_to_vmem [thread:$0]  %s1367_s0, 512, %s21_s24, [#allocation3], %s1373_s2, %s1373_s2, %s1374_s26  }
  0x1b   :  { %s33_s6 = sshll.u32 %s1368_s1, 4  ;;  %s52_s9 = sshll.u32 %s1370_s3, 4  ;;  %s34_s6 = int_to_ptr.vmem [resolvable:$true] %s33_s6  ;;  %s53_s9 = int_to_ptr.vmem [resolvable:$true] %s52_s9 }
  0x1c   :  { %s756_s10 = scalar_lea.vmem %s34_s6, 64  ;;  %p761_p11 = scmp.lt.s32.totalorder %s34_s6, %s34_s6 }
  0x1d   :  { %p757_p10 = scmp.ne.s32.totalorder %s34_s6, %s756_s10  ;;  %p762_p12 = scmp.lt.s32.totalorder %s756_s10, %s756_s10 }
  0x1f   :  { %p763_p13 = por %p762_p12, %p761_p11 }
  0x21   :  { %p764_p0 = pnand %p763_p13, %p757_p10 }
  0x23   :  { %767 = shalt.err (!%p764_p0)
}
  0x24   :  { %s826_s11 = smov [#allocation6]   ;;  %s768_s0 = scalar_lea.vmem %s53_s9, 256 }
  0x25   :  { %36 = dma.vmem_to_smem %s34_s6, 64, %s826_s11, [#allocation5]  }
  0x26   :  { %p769_p1 = scmp.ne.s32.totalorder %s53_s9, %s768_s0  ;;  %p773_p2 = scmp.lt.s32.totalorder %s53_s9, %s53_s9 }
  0x27   :  { %p774_p3 = scmp.lt.s32.totalorder %s768_s0, %s768_s0 }
  0x29   :  { %p775_p4 = por %p774_p3, %p773_p2 }
  0x2b   :  { %p776_p5 = pnand %p775_p4, %p769_p1 }
  0x2d   :  { %779 = shalt.err (!%p776_p5)
}
  0x2e   :  { %s827_s1 = smov [#allocation9]   ;;  %s65_s13 = sshll.u32 %s1371_s4, 4  ;;  %s66_s13 = int_to_ptr.vmem [resolvable:$true] %s65_s13 }
  0x2f   :  { %58 = dma.vmem_to_smem %s53_s9, 256, %s827_s1, [#allocation8], %s1373_s2, %s1373_s2, %s1374_s26  }
  0x30   :  { %s780_s14 = scalar_lea.vmem %s66_s13, 16  ;;  %p785_p7 = scmp.lt.s32.totalorder %s66_s13, %s66_s13 }
  0x31   :  { %p781_p6 = scmp.ne.s32.totalorder %s66_s13, %s780_s14  ;;  %p786_p8 = scmp.lt.s32.totalorder %s780_s14, %s780_s14 }
  0x33   :  { %p787_p9 = por %p786_p8, %p785_p7 }
  0x35   :  { %p788_p10 = pnand %p787_p9, %p781_p6 }
  0x37   :  { %791 = shalt.err (!%p788_p10)
}
  0x38   :  { %s828_s15 = smov [#allocation10]  }
  0x39   :  { %68 = dma.vmem_to_smem %s66_s13, 16, %s828_s15, [#allocation11]  }
  0x3a   :  { %812 = dma.done.wait [#allocation3], 512  }
  0x3b   :  { %813 = vsyncadd [#allocation3], 4294966784 }
  0x3c   :  { %814 = dma.done.wait [#allocation5], 64  }
  0x3d   :  { %815 = vsyncadd [#allocation5], 4294967232 }
  0x3e   :  { %816 = dma.done.wait [#allocation8], 272  }
  0x3f   :  { %817 = vsyncadd [#allocation8], 4294967024 }
  0x40   :  { %818 = dma.done.wait [#allocation11], 16  }
  0x41   :  { %819 = vsyncadd [#allocation11], 4294967280 }
  0x42   :  { %84 = sfence }
  0x43   :  { %s881_s4 = sld [smem:[#allocation6]]  ;;  %v257_v0 = vld [vmem:[#allocation2] sm:$0xff]  ;;  %v260_v19 = vld [vmem:[#allocation2 + $0x8] sm:$0xff]  ;;  %v1115_v48 = vld [vmem:[#allocation2 + $0x10] sm:$0xff] }
  0x44   :  { %s883_s16 = sld [smem:[#allocation6 + $0x1]] }
  0x45   :  { %s885_s17 = sld [smem:[#allocation6 + $0x2]] }
  0x46   :  { %s887_s18 = sld [smem:[#allocation6 + $0x3]] }
  0x47   :  { %s889_s19 = sld [smem:[#allocation6 + $0x4]] }
  0x48   :  { %s891_s20 = sld [smem:[#allocation6 + $0x5]] }
  0x49   :  { %s897_s25 = sld [smem:[#allocation6 + $0x6]] }
  0x4a   :  { %s899_s27 = sld [smem:[#allocation6 + $0x7]] }
  0x4b   :  { %s901_s28 = sld [smem:[#allocation6 + $0x8]] }
  0x4c   :  { %s903_s29 = sld [smem:[#allocation6 + $0x9]] }
  0x4d   :  { %s907_s7 = sld [smem:[#allocation6 + $0xa]] }
  0x4e   :  { %s909_s8 = sld [smem:[#allocation6 + $0xb]] }
  0x4f   :  { %s915_s1 = sld [smem:[#allocation6 + $0x80]] }
  0x50   :  { %s917_s3 = sld [smem:[#allocation6 + $0x81]] }
  0x51   :  { %s919_s12 = sld [smem:[#allocation6 + $0x82]] }
  0x52   :  { %s921_s13 = sld [smem:[#allocation6 + $0x83]] }
  0x53   :  { %s925_s2 = sld [smem:[#allocation6 + $0x84]] }
  0x54   :  { %s927_s26 = sld [smem:[#allocation6 + $0x85]] }
  0x55   :  { %1399 = sst [smem:[#allocation18_spill]] %s915_s1 }
  0x56   :  { %1400 = sst [smem:[#allocation19_spill]] %s917_s3 }
  0x57   :  { %1401 = sst [smem:[#allocation20_spill]] %s919_s12 }
  0x58   :  { %1402 = sst [smem:[#allocation21_spill]] %s921_s13 }
  0x59   :  { %1403 = sst [smem:[#allocation22_spill]] %s925_s2 }
  0x5a   :  { %1404 = sst [smem:[#allocation23_spill]] %s927_s26 }
  0x5b   :  { %s933_s6 = sld [smem:[#allocation6 + $0x86]] }
  0x5c   :  { %s935_s30 = sld [smem:[#allocation6 + $0x87]] }
  0x5d   :  { %s937_s24 = sld [smem:[#allocation6 + $0x88]] }
  0x5e   :  { %s939_s15 = sld [smem:[#allocation6 + $0x89]] }
  0x5f   :  { %s943_s22 = sld [smem:[#allocation6 + $0x8a]] }
  0x60   :  { %s945_s11 = sld [smem:[#allocation6 + $0x8b]] }
  0x61   :  { %1405 = sst [smem:[#allocation24_spill]] %s933_s6 }
  0x62   :  { %1406 = sst [smem:[#allocation25_spill]] %s935_s30 }
  0x63   :  { %1407 = sst [smem:[#allocation26_spill]] %s937_s24 }
  0x64   :  { %1408 = sst [smem:[#allocation27_spill]] %s939_s15 }
  0x65   :  { %1409 = sst [smem:[#allocation28_spill]] %s943_s22 }
  0x66   :  { %1410 = sst [smem:[#allocation29_spill]] %s945_s11 }
  0x67   :  { %s951_s5 = sld [smem:[#allocation6 + $0x100]] }
  0x68   :  { %s953_s13 = sld [smem:[#allocation6 + $0x101]] }
  0x69   :  { %s955_s12 = sld [smem:[#allocation6 + $0x102]] }
  0x6a   :  { %s957_s23 = sld [smem:[#allocation6 + $0x103]] }
  0x6b   :  { %s961_s2 = sld [smem:[#allocation6 + $0x104]] }
  0x6c   :  { %s963_s10 = sld [smem:[#allocation6 + $0x105]] }
  0x6d   :  { %1411 = sst [smem:[#allocation30_spill]] %s951_s5 }
  0x6e   :  { %1412 = sst [smem:[#allocation31_spill]] %s953_s13 }
  0x6f   :  { %1413 = sst [smem:[#allocation32_spill]] %s955_s12 }
  0x70   :  { %1414 = sst [smem:[#allocation33_spill]] %s957_s23 }
  0x71   :  { %1415 = sst [smem:[#allocation34_spill]] %s961_s2 }
  0x72   :  { %1416 = sst [smem:[#allocation35_spill]] %s963_s10 }
  0x73   :  { %s969_s24 = sld [smem:[#allocation6 + $0x106]] }
  0x74   :  { %s971_s30 = sld [smem:[#allocation6 + $0x107]] }
  0x75   :  { %s973_s6 = sld [smem:[#allocation6 + $0x108]] }
  0x76   :  { %s975_s26 = sld [smem:[#allocation6 + $0x109]] }
  0x77   :  { %s979_s22 = sld [smem:[#allocation6 + $0x10a]] }
  0x78   :  { %s981_s0 = sld [smem:[#allocation6 + $0x10b]] }
  0x79   :  { %1417 = sst [smem:[#allocation36_spill]] %s969_s24 }
  0x7a   :  { %1418 = sst [smem:[#allocation37_spill]] %s971_s30 }
  0x7b   :  { %1419 = sst [smem:[#allocation38_spill]] %s973_s6 }
  0x7c   :  { %1420 = sst [smem:[#allocation39_spill]] %s975_s26 }
  0x7d   :  { %s987_s12 = sld [smem:[#allocation6 + $0x180]] }
  0x7e   :  { %1421 = sst [smem:[#allocation40_spill]] %s981_s0 }
  0x7f   :  { %s989_s13 = sld [smem:[#allocation6 + $0x181]] }
  0x80   :  { %s991_s5 = sld [smem:[#allocation6 + $0x182]] }
  0x81   :  { %s993_s11 = sld [smem:[#allocation6 + $0x183]] }
  0x82   :  { %s995_s14 = sld [smem:[#allocation6 + $0x184]] }
  0x83   :  { %s997_s9 = sld [smem:[#allocation6 + $0x185]] }
  0x84   :  { %s1007_s2 = sld [smem:[#allocation6 + $0x186]] }
  0x85   :  { %s1009_s3 = sld [smem:[#allocation7]] }
  0x86   :  { %s1011_s1 = sld [smem:[#allocation6 + $0x187]] }
  0x87   :  { %s1013_s23 = sld [smem:[#allocation7 + $0x1]] }
  0x88   :  { %s1422_s21 = ssub.f32 0.0, %s881_s4 }
  0x89   :  { %s1423_s15 = ssub.f32 0.0, %s883_s16 }
  0x8a   :  { %v267_v1 = vstv %s1422_s21  ;;  %s1019_s6 = sld [smem:[#allocation6 + $0x188]] }
  0x8b   :  { %v292_v2 = vstv %s1423_s15  ;;  %s1425_s24 = ssub.f32 0.0, %s885_s17  ;;  %v268_v7 = vmul.f32 %v267_v1, %v257_v0 }
  0x8c   :  { %s1426_s10 = ssub.f32 0.0, %s887_s18  ;;  %v293_v8 = vmul.f32 %v292_v2, %v257_v0 }
  0x8d   :  { %v315_v3 = vstv %s1425_s24  ;;  %s1427_s30 = ssub.f32 0.0, %s889_s19 }
  0x8e   :  { %v338_v4 = vstv %s1426_s10  ;;  %s1027_s26 = sld [smem:[#allocation7 + $0x2]]  ;;  %v1039_v11 = vmul.f32 %v315_v3, %v257_v0 }
  0x8f   :  { %v361_v5 = vstv %s1427_s30  ;;  %s1428_s0 = ssub.f32 0.0, %s891_s20  ;;  %v1041_v12 = vmul.f32 %v338_v4, %v257_v0 }
  0x90   :  { %1424 = sst [smem:[#allocation41_spill]] %s1019_s6  ;;  %v1043_v13 = vmul.f32 %v361_v5, %v257_v0  ;;  %v1151_v5 = vld [vmem:[#allocation2 + $0x18] sm:$0xff] }
  0x91   :  { %v384_v6 = vstv %s1428_s0  ;;  %s1031_s4 = sld [smem:[#allocation6 + $0x189]] }
  0x92   :  { %s1430_s16 = sld [smem:[#allocation18_spill]]  ;;  %v1049_v15 = vmul.f32 %v384_v6, %v257_v0 }
  0x93   :  { %s1431_s21 = ssub.f32 0.0, %s897_s25 }
  0x94   :  { %s1432_s17 = sld [smem:[#allocation19_spill]] }
  0x95   :  { %v407_v9 = vstv %s1431_s21  ;;  %s1433_s18 = ssub.f32 0.0, %s899_s27 }
  0x96   :  { %s1037_s19 = sld [smem:[#allocation7 + $0x3]]  ;;  %v1062_v22 = vmul.f32 %v407_v9, %v257_v0 }
  0x97   :  { %1429 = sst [smem:[#allocation42_spill]] %s1031_s4  ;;  %v430_v10 = vstv %s1433_s18 }
  0x98   :  { %s1434_s24 = sld [smem:[#allocation20_spill]]  ;;  %v1064_v23 = vmul.f32 %v430_v10, %v257_v0 }
  0x99   :  { %s1435_s20 = sld [smem:[#allocation21_spill]] }
  0x9a   :  { %s1436_s30 = ssub.f32 0.0, %s901_s28 }
  0x9b   :  { %s1437_s10 = sld [smem:[#allocation22_spill]] }
  0x9c   :  { %v453_v14 = vstv %s1436_s30  ;;  %s1047_s0 = sld [smem:[#allocation7 + $0x4]] }
  0x9d   :  { %s1438_s25 = ssub.f32 0.0, %s903_s29  ;;  %v1074_v27 = vmul.f32 %v453_v14, %v257_v0 }
  0x9e   :  { %s1439_s27 = sld [smem:[#allocation23_spill]] }
  0x9f   :  { %v476_v16 = vstv %s1438_s25  ;;  %s1440_s15 = ssub.f32 0.0, %s907_s7 }
  0xa0   :  { %s1441_s21 = ssub.f32 0.0, %s909_s8  ;;  %v1079_v29 = vmul.f32 %v476_v16, %v257_v0 }
  0xa1   :  { %v499_v17 = vstv %s1440_s15  ;;  %s182_s18 = ssub.f32 0.0, %s1009_s3 }
  0xa2   :  { %v522_v18 = vstv %s1441_s21  ;;  %s1442_s4 = ssub.f32 0.0, %s1430_s16  ;;  %v1081_v30 = vmul.f32 %v499_v17, %v257_v0 }
  0xa3   :  { %s1443_s6 = ssub.f32 0.0, %s1432_s17  ;;  %v1083_v31 = vmul.f32 %v522_v18, %v257_v0  ;;  %v269_v36 = vstv %s182_s18 }
  0xa4   :  { %v271_v20 = vstv %s1442_s4  ;;  %s1444_s28 = sld [smem:[#allocation24_spill]]  ;;  %v270_v49 = vadd.f32 %v269_v36, %v268_v7 }
  0xa5   :  { %v296_v21 = vstv %s1443_s6  ;;  %s1445_s30 = sld [smem:[#allocation25_spill]]  ;;  %v272_v32 = vmul.f32 %v271_v20, %v260_v19 }
  0xa6   :  { %s1066_s29 = sld [smem:[#allocation7 + $0x5]]  ;;  %v297_v33 = vmul.f32 %v296_v21, %v260_v19 }
  0xa7   :  { %s1446_s25 = ssub.f32 0.0, %s1434_s24  ;;  %v273_v1 = vadd.f32 %v272_v32, %v270_v49 }
  0xa8   :  { %s1447_s7 = ssub.f32 0.0, %s1435_s20 }
  0xa9   :  { %v319_v24 = vstv %s1446_s25  ;;  %s1448_s8 = ssub.f32 0.0, %s1437_s10 }
  0xaa   :  { %v342_v25 = vstv %s1447_s7  ;;  %s184_s3 = ssub.f32 0.0, %s1013_s23  ;;  %v320_v37 = vmul.f32 %v319_v24, %v260_v19 }
  0xab   :  { %v365_v26 = vstv %s1448_s8  ;;  %s1449_s4 = ssub.f32 0.0, %s1439_s27  ;;  %v1092_v38 = vmul.f32 %v342_v25, %v260_v19 }
  0xac   :  { %s1450_s6 = sld [smem:[#allocation26_spill]]  ;;  %v1094_v39 = vmul.f32 %v365_v26, %v260_v19  ;;  %v294_v44 = vstv %s184_s3 }
  0xad   :  { %v388_v28 = vstv %s1449_s4  ;;  %s1451_s16 = sld [smem:[#allocation27_spill]]  ;;  %v295_v57 = vadd.f32 %v294_v44, %v293_v8 }
  0xae   :  { %s1452_s17 = sld [smem:[#allocation28_spill]]  ;;  %v1098_v40 = vmul.f32 %v388_v28, %v260_v19 }
  0xaf   :  { %s1085_s24 = sld [smem:[#allocation6 + $0x18a]]  ;;  %v298_v10 = vadd.f32 %v297_v33, %v295_v57 }
  0xb0   :  { %s1453_s20 = ssub.f32 0.0, %s1444_s28 }
  0xb1   :  { %s1454_s10 = ssub.f32 0.0, %s1445_s30 }
  0xb2   :  { %v411_v34 = vstv %s1453_s20  ;;  %s1455_s23 = sld [smem:[#allocation29_spill]] }
  0xb3   :  { %v434_v35 = vstv %s1454_s10  ;;  %s186_s27 = ssub.f32 0.0, %s1027_s26  ;;  %v1107_v45 = vmul.f32 %v411_v34, %v260_v19 }
  0xb4   :  { %s1456_s15 = sld [smem:[#allocation30_spill]]  ;;  %v1109_v46 = vmul.f32 %v434_v35, %v260_v19 }
  0xb5   :  { %s1457_s21 = sld [smem:[#allocation31_spill]]  ;;  %v317_v53 = vstv %s186_s27 }
  0xb6   :  { %s1458_s25 = sld [smem:[#allocation32_spill]]  ;;  %v318_v2 = vadd.f32 %v317_v53, %v1039_v11 }
  0xb7   :  { %s1096_s7 = sld [smem:[#allocation7 + $0x6]] }
  0xb8   :  { %s1459_s28 = ssub.f32 0.0, %s1450_s6 }
  0xb9   :  { %s1460_s30 = ssub.f32 0.0, %s1451_s16 }
  0xba   :  { %v457_v41 = vstv %s1459_s28  ;;  %s1461_s8 = ssub.f32 0.0, %s1452_s17 }
  0xbb   :  { %v480_v42 = vstv %s1460_s30  ;;  %s188_s26 = ssub.f32 0.0, %s1037_s19  ;;  %v1124_v54 = vmul.f32 %v457_v41, %v260_v19 }
  0xbc   :  { %v503_v43 = vstv %s1461_s8  ;;  %s1462_s18 = sld [smem:[#allocation33_spill]]  ;;  %v1126_v55 = vmul.f32 %v480_v42, %v260_v19 }
  0xbd   :  { %s1463_s4 = ssub.f32 0.0, %s1455_s23  ;;  %v1128_v56 = vmul.f32 %v503_v43, %v260_v19  ;;  %v340_v0 = vstv %s188_s26 }
  0xbe   :  { %s1464_s20 = sld [smem:[#allocation34_spill]]  ;;  %v341_v14 = vadd.f32 %v340_v0, %v1041_v12  ;;  %v321_v12 = vadd.f32 %v320_v37, %v318_v2 }
  0xbf   :  { %v526_v47 = vstv %s1463_s4  ;;  %s1113_s10 = sld [smem:[#allocation7 + $0x7]] }
  0xc0   :  { %s1465_s6 = ssub.f32 0.0, %s1456_s15  ;;  %v1136_v60 = vmul.f32 %v526_v47, %v260_v19  ;;  %v344_v35 = vadd.f32 %v1092_v38, %v341_v14 }
  0xc1   :  { %s1466_s16 = ssub.f32 0.0, %s1457_s21 }
  0xc2   :  { %v274_v50 = vstv %s1465_s6  ;;  %s1467_s19 = ssub.f32 0.0, %s1458_s25 }
  0xc3   :  { %v299_v51 = vstv %s1466_s16  ;;  %s190_s3 = ssub.f32 0.0, %s1047_s0  ;;  %v275_v61 = vmul.f32 %v274_v50, %v1115_v48 }
  0xc4   :  { %v322_v52 = vstv %s1467_s19  ;;  %s1468_s17 = sld [smem:[#allocation35_spill]]  ;;  %v300_v62 = vmul.f32 %v299_v51, %v1115_v48 }
  0xc5   :  { %s1469_s23 = sld [smem:[#allocation36_spill]]  ;;  %v323_v63 = vmul.f32 %v322_v52, %v1115_v48  ;;  %v363_v16 = vstv %s190_s3  ;;  %v276_v21 = vadd.f32 %v275_v61, %v273_v1 }
  0xc6   :  { %s1130_s28 = sld [smem:[#allocation7 + $0x8]]  ;;  %v364_v32 = vadd.f32 %v363_v16, %v1043_v13  ;;  %v301_v34 = vadd.f32 %v300_v62, %v298_v10 }
  0xc7   :  { %s1470_s30 = ssub.f32 0.0, %s1462_s18  ;;  %v324_v44 = vadd.f32 %v323_v63, %v321_v12 }
  0xc8   :  { %s1471_s15 = ssub.f32 0.0, %s1464_s20  ;;  %v367_v50 = vadd.f32 %v1094_v39, %v364_v32 }
  0xc9   :  { %v345_v58 = vstv %s1470_s30  ;;  %s1472_s0 = sld [smem:[#allocation37_spill]] }
  0xca   :  { %v368_v59 = vstv %s1471_s15  ;;  %s192_s27 = ssub.f32 0.0, %s1066_s29  ;;  %v346_v7 = vmul.f32 %v345_v58, %v1115_v48 }
  0xcb   :  { %s1142_s21 = sld [smem:[#allocation7 + $0x9]]  ;;  %v369_v8 = vmul.f32 %v368_v59, %v1115_v48 }
  0xcc   :  { %s1473_s25 = ssub.f32 0.0, %s1468_s17  ;;  %v386_v25 = vstv %s192_s27  ;;  %v347_v57 = vadd.f32 %v346_v7, %v344_v35 }
  0xcd   :  { %s1474_s8 = ssub.f32 0.0, %s1469_s23  ;;  %v387_v41 = vadd.f32 %v386_v25, %v1049_v15 }
  0xce   :  { %v391_v3 = vstv %s1473_s25  ;;  %s1475_s18 = sld [smem:[#allocation38_spill]] }
  0xcf   :  { %v414_v4 = vstv %s1474_s8  ;;  %s1476_s29 = sld [smem:[#allocation39_spill]]  ;;  %v392_v17 = vmul.f32 %v391_v3, %v1115_v48  ;;  %v390_v61 = vadd.f32 %v1098_v40, %v387_v41  ;;  %v370_v3 = vadd.f32 %v369_v8, %v367_v50 }
  0xd0   :  { %s1149_s4 = sld [smem:[#allocation7 + $0xa]]  ;;  %v1167_v18 = vmul.f32 %v414_v4, %v1115_v48 }
  0xd1   :  { %s1477_s20 = ssub.f32 0.0, %s987_s12 }
  0xd2   :  { %s1478_s26 = ssub.f32 0.0, %s1472_s0 }
  0xd3   :  { %v277_v6 = vstv %s1477_s20  ;;  %s194_s6 = ssub.f32 0.0, %s1096_s7 }
  0xd4   :  { %v437_v9 = vstv %s1478_s26  ;;  %s1479_s16 = ssub.f32 0.0, %s989_s13  ;;  %v278_v24 = vmul.f32 %v277_v6, %v1151_v5 }
  0xd5   :  { %s1163_s19 = sld [smem:[#allocation7 + $0xb]]  ;;  %v1182_v33 = vmul.f32 %v437_v9, %v1115_v48  ;;  %v409_v37 = vstv %s194_s6 }
  0xd6   :  { %v302_v11 = vstv %s1479_s16  ;;  %s1480_s12 = ssub.f32 0.0, %s1475_s18  ;;  %v279_v38 = vadd.f32 %v278_v24, %v276_v21  ;;  %v410_v52 = vadd.f32 %v409_v37, %v1062_v22 }
  0xd7   :  { %s1481_s17 = ssub.f32 0.0, %s1476_s29  ;;  %v303_v26 = vmul.f32 %v302_v11, %v1151_v5  ;;  %v393_v11 = vadd.f32 %v392_v17, %v390_v61 }
  0xd8   :  { %v460_v19 = vstv %s1480_s12  ;;  %s196_s13 = ssub.f32 0.0, %s1113_s10  ;;  %v280_v0 = vmul.f32 1.442695, %v279_v38  ;;  %v413_v6 = vadd.f32 %v1107_v45, %v410_v52 }
  0xd9   :  { %v483_v20 = vstv %s1481_s17  ;;  %s1175_s7 = sld [smem:[#allocation6 + $0x18b]]  ;;  %v1191_v42 = vmul.f32 %v460_v19, %v1115_v48  ;;  %v304_v53 = vadd.f32 %v303_v26, %v301_v34 }
  0xda   :  { %s1482_s3 = ssub.f32 0.0, %s991_s5  ;;  %v1194_v13 = vmul.f32 %v483_v20, %v1115_v48  ;;  %v432_v49 = vstv %s196_s13  ;;  %668 = vpow2.f32 %v280_v0  ;;  %v416_v21 = vadd.f32 %v1167_v18, %v413_v6 }
  0xdb   :  { %s198_s10 = ssub.f32 0.0, %s1130_s28  ;;  %v433_v63 = vadd.f32 %v432_v49, %v1064_v23  ;;  %v305_v23 = vmul.f32 1.442695, %v304_v53 }
  0xdc   :  { %v325_v28 = vstv %s1482_s3  ;;  %s1483_s23 = ssub.f32 0.0, %s993_s11 }
  0xdd   :  { %s170_s30 = ssub.f32 0.0, %s1007_s2  ;;  %v326_v47 = vmul.f32 %v325_v28, %v1151_v5  ;;  %v455_v59 = vstv %s198_s10  ;;  %v436_v14 = vadd.f32 %v1109_v46, %v433_v63  ;;  %670 = vpow2.f32 %v305_v23 }
  0xde   :  { %v348_v36 = vstv %s1483_s23  ;;  %s1484_s5 = ssub.f32 0.0, %s979_s22  ;;  %v456_v40 = vadd.f32 %v455_v59, %v1074_v27 }
  0xdf   :  { %s1485_s28 = sld [smem:[#allocation41_spill]]  ;;  %v349_v15 = vmul.f32 %v348_v36, %v1151_v5  ;;  %v417_v62 = vstv %s170_s30  ;;  %v327_v22 = vadd.f32 %v326_v47, %v324_v44  ;;  %v439_v26 = vadd.f32 %v1182_v33, %v436_v14 }
  0xe0   :  { %v1198_v43 = vstv %s1484_s5  ;;  %s200_s15 = ssub.f32 0.0, %s1142_s21  ;;  %v418_v9 = vmul.f32 %v417_v62, %v1151_v5  ;;  %v459_v17 = vadd.f32 %v1124_v54, %v456_v40 }
  0xe1   :  { %s1486_s11 = sld [smem:[#allocation40_spill]]  ;;  %v350_v7 = vadd.f32 %v349_v15, %v347_v57  ;;  %v328_v45 = vmul.f32 1.442695, %v327_v22  ;;  %v507_v54 = vmul.f32 %v1198_v43, %v1115_v48 }
  0xe2   :  { %s172_s2 = ssub.f32 0.0, %s1011_s1  ;;  %v478_v2 = vstv %s200_s15  ;;  %v419_v35 = vadd.f32 %v418_v9, %v416_v21  ;;  %v462_v36 = vadd.f32 %v1191_v42, %v459_v17 }
  0xe3   :  { %s1487_s0 = ssub.f32 0.0, %s995_s14  ;;  %v479_v8 = vadd.f32 %v478_v2, %v1079_v29  ;;  %v351_v29 = vmul.f32 1.442695, %v350_v7  ;;  %672 = vpow2.f32 %v328_v45 }
  0xe4   :  { %s1488_s22 = sld [smem:[#allocation42_spill]]  ;;  %v440_v16 = vstv %s172_s2  ;;  %v420_v44 = vmul.f32 1.442695, %v419_v35 }
  0xe5   :  { %v371_v51 = vstv %s1487_s0  ;;  %s202_s27 = ssub.f32 0.0, %s1149_s4  ;;  %v441_v24 = vmul.f32 %v440_v16, %v1151_v5  ;;  %v482_v18 = vadd.f32 %v1126_v55, %v479_v8  ;;  %674 = vpow2.f32 %v351_v29 }
  0xe6   :  { %s1489_s21 = ssub.f32 0.0, %s997_s9  ;;  %v372_v1 = vmul.f32 %v371_v51, %v1151_v5 }
  0xe7   :  { %s174_s25 = ssub.f32 0.0, %s1485_s28  ;;  %v501_v10 = vstv %s202_s27  ;;  %v442_v43 = vadd.f32 %v441_v24, %v439_v26  ;;  %v485_v38 = vadd.f32 %v1194_v13, %v482_v18  ;;  %v669_v13 = vpop.eup %668 }
  0xe8   :  { %v394_v58 = vstv %s1489_s21  ;;  %s1490_s8 = ssub.f32 0.0, %s1486_s11  ;;  %v373_v20 = vadd.f32 %v372_v1, %v370_v3  ;;  %v502_v46 = vadd.f32 %v501_v10, %v1081_v30 }
  0xe9   :  { %s204_s14 = ssub.f32 0.0, %s1163_s19  ;;  %v395_v4 = vmul.f32 %v394_v58, %v1151_v5  ;;  %v463_v19 = vstv %s174_s25  ;;  %v443_v15 = vmul.f32 1.442695, %v442_v43  ;;  %v282_v58 = vadd.f32 1.0, %v669_v13 }
  0xea   :  { %v529_v39 = vstv %s1490_s8  ;;  %s176_s9 = ssub.f32 0.0, %s1488_s22  ;;  %v464_v30 = vmul.f32 %v463_v19, %v1151_v5  ;;  %v374_v34 = vmul.f32 1.442695, %v373_v20  ;;  %v505_v33 = vadd.f32 %v1128_v56, %v502_v46  ;;  %v671_v53 = vpop.eup %670 }
  0xeb   :  { %s178_s18 = ssub.f32 0.0, %s1085_s24  ;;  %v524_v27 = vstv %s204_s14  ;;  %v396_v25 = vadd.f32 %v395_v4, %v393_v11  ;;  %v530_v55 = vmul.f32 %v529_v39, %v1115_v48  ;;  %v307_v62 = vadd.f32 1.0, %v671_v53 }
  0xec   :  { %s180_s29 = ssub.f32 0.0, %s1175_s7  ;;  %v486_v12 = vstv %s176_s9  ;;  %v525_v28 = vadd.f32 %v524_v27, %v1083_v31  ;;  %676 = vpow2.f32 %v374_v34  ;;  %v465_v47 = vadd.f32 %v464_v30, %v462_v36 }
  0xed   :  { %s1229_s4 = sld [smem:[#allocation9]]  ;;  %v509_v32 = vstv %s178_s18  ;;  %v487_v31 = vmul.f32 %v486_v12, %v1151_v5  ;;  %v397_v41 = vmul.f32 1.442695, %v396_v25  ;;  %v508_v49 = vadd.f32 %v507_v54, %v505_v33 }
  0xee   :  { %s1231_s20 = sld [smem:[#allocation9 + $0x1]]  ;;  %v532_v37 = vstv %s180_s29  ;;  %v528_v42 = vadd.f32 %v1136_v60, %v525_v28  ;;  %v510_v56 = vmul.f32 %v509_v32, %v1151_v5  ;;  %v466_v60 = vmul.f32 1.442695, %v465_v47 }
  0xef   :  { %s1236_s1 = sld [smem:[#allocation9 + $0x80]]  ;;  %v533_v48 = vmul.f32 %v532_v37, %v1151_v5  ;;  %678 = vpow2.f32 %v397_v41  ;;  %v488_v50 = vadd.f32 %v487_v31, %v485_v38 }
  0xf0   :  { %s1239_s26 = sld [smem:[#allocation9 + $0x81]]  ;;  %v531_v51 = vadd.f32 %v530_v55, %v528_v42  ;;  %680 = vpow2.f32 %v420_v44  ;;  %v511_v52 = vadd.f32 %v510_v56, %v508_v49  ;;  %v673_v59 = vpop.eup %672 }
  0xf1   :  { %s1251_s6 = sld [smem:[#allocation9 + $0x100]]  ;;  %682 = vpow2.f32 %v443_v15  ;;  %v489_v5 = vmul.f32 1.442695, %v488_v50  ;;  %v330_v0 = vadd.f32 1.0, %v673_v59 }
  0xf2   :  { %s1257_s24 = sld [smem:[#allocation9 + $0x101]]  ;;  %v534_v57 = vadd.f32 %v533_v48, %v531_v51  ;;  %684 = vpow2.f32 %v466_v60  ;;  %v512_v61 = vmul.f32 1.442695, %v511_v52  ;;  %v675_v63 = vpop.eup %674 }
  0xf3   :  { %s206_s16 = ssub.f32 0.0, %s1229_s4  ;;  %686 = vpow2.f32 %v489_v5  ;;  %v353_v1 = vadd.f32 1.0, %v675_v63 }
  0xf4   :  { %s208_s19 = ssub.f32 0.0, %s1231_s20  ;;  %v535_v39 = vmul.f32 1.442695, %v534_v57  ;;  %688 = vrcp.f32 %v282_v58 }
  0xf5   :  { %s210_s12 = ssub.f32 0.0, %s1236_s1  ;;  %690 = vpow2.f32 %v512_v61  ;;  %v284_v8 = vstv %s206_s16 }
  0xf6   :  { %s212_s17 = ssub.f32 0.0, %s1239_s26  ;;  %692 = vrcp.f32 %v307_v62  ;;  %v288_v19 = vstv %s208_s19 }
  0xf7   :  { %s1267_s13 = sld [smem:[#allocation9 + $0x180]]  ;;  %694 = vpow2.f32 %v535_v39  ;;  %v309_v21 = vstv %s210_s12 }
  0xf8   :  { %s1269_s7 = sld [smem:[#allocation9 + $0x181]]  ;;  %696 = vrcp.f32 %v330_v0  ;;  %v312_v46 = vstv %s212_s17 }
  0xf9   :  { %s1271_s3 = sld [smem:[#allocation9 + $0x200]]  ;;  %v677_v22 = vpop.eup %676  ;;  %698 = vrcp.f32 %v353_v1 }
  0xfa   :  { %s1273_s10 = sld [smem:[#allocation9 + $0x201]]  ;;  %v376_v3 = vadd.f32 1.0, %v677_v22 }
  0xfb   :  { %s1275_s23 = sld [smem:[#allocation9 + $0x280]] }
  0xfc   :  { %s1277_s30 = sld [smem:[#allocation9 + $0x281]]  ;;  %v679_v2 = vpop.eup %678  ;;  %700 = vrcp.f32 %v376_v3 }
  0xfd   :  { %s214_s5 = ssub.f32 0.0, %s1251_s6  ;;  %v681_v4 = vpop.eup %680  ;;  %v399_v6 = vadd.f32 1.0, %v679_v2 }
  0xfe   :  { %s216_s28 = ssub.f32 0.0, %s1257_s24  ;;  %v683_v40 = vpop.eup %682  ;;  %v422_v23 = vadd.f32 1.0, %v681_v4 }
  0xff   :  { %s218_s15 = ssub.f32 0.0, %s1267_s13  ;;  %v685_v7 = vpop.eup %684  ;;  %702 = vrcp.f32 %v399_v6  ;;  %v445_v9 = vadd.f32 1.0, %v683_v40  ;;  %v332_v25 = vstv %s214_s5 }
 0x100   :  { %s1287_s21 = sld [smem:[#allocation9 + $0x300]]  ;;  %v687_v10 = vpop.eup %686  ;;  %704 = vrcp.f32 %v422_v23  ;;  %v468_v14 = vadd.f32 1.0, %v685_v7  ;;  %v335_v18 = vstv %s216_s28 }
 0x101   :  { %s1289_s25 = sld [smem:[#allocation9 + $0x301]]  ;;  %v689_v11 = vpop.eup %688  ;;  %706 = vrcp.f32 %v445_v9  ;;  %v491_v27 = vadd.f32 1.0, %v687_v10  ;;  %v355_v34 = vstv %s218_s15 }
 0x102   :  { %s1291_s8 = sld [smem:[#allocation9 + $0x380]]  ;;  %v691_v16 = vpop.eup %690  ;;  %v285_v17 = vmul.f32 %v689_v11, %v284_v8  ;;  %708 = vrcp.f32 %v468_v14  ;;  %v289_v12 = vmul.f32 %v689_v11, %v288_v19 }
 0x103   :  { %s1293_s14 = sld [smem:[#allocation9 + $0x381]]  ;;  %v693_v45 = vpop.eup %692  ;;  %v514_v29 = vadd.f32 1.0, %v691_v16  ;;  %710 = vrcp.f32 %v491_v27 }
 0x104   :  { %s1295_s9 = sld [smem:[#allocation9 + $0x400]]  ;;  %v695_v20 = vpop.eup %694  ;;  %v310_v26 = vmul.f32 %v693_v45, %v309_v21  ;;  %v313_v32 = vmul.f32 %v693_v45, %v312_v46 }
 0x105   :  { %s1297_s18 = sld [smem:[#allocation9 + $0x401]]  ;;  %v697_v24 = vpop.eup %696  ;;  %v537_v28 = vadd.f32 1.0, %v695_v20  ;;  %712 = vrcp.f32 %v514_v29 }
 0x106   :  { %s1299_s29 = sld [smem:[#allocation10]]  ;;  %v699_v30 = vpop.eup %698  ;;  %v333_v31 = vmul.f32 %v697_v24, %v332_v25  ;;  %v336_v41 = vmul.f32 %v697_v24, %v335_v18 }
 0x107   :  { %s1301_s27 = sld [smem:[#allocation10 + $0x1]]  ;;  %v356_v42 = vmul.f32 %v699_v30, %v355_v34  ;;  %714 = vrcp.f32 %v537_v28 }
 0x108   :  { %s230_s22 = ssub.f32 0.0, %s1287_s21 }
 0x109   :  { %s232_s0 = ssub.f32 0.0, %s1289_s25  ;;  %v701_v55 = vpop.eup %700 }
 0x10a   :  { %s234_s2 = ssub.f32 0.0, %s1291_s8  ;;  %v424_v53 = vstv %s230_s22 }
 0x10b   :  { %s236_s11 = ssub.f32 0.0, %s1293_s14  ;;  %v427_v58 = vstv %s232_s0 }
 0x10c   :  { %s254_s4 = ssub.f32 0.0, %s1299_s29  ;;  %v703_v44 = vpop.eup %702  ;;  %v447_v63 = vstv %s234_s2 }
 0x10d   :  { %s256_s20 = ssub.f32 0.0, %s1301_s27  ;;  %v705_v13 = vpop.eup %704  ;;  %v450_v22 = vstv %s236_s11  ;;  %s829_s11 = smov [#allocation12]  }
 0x10e   :  { %s1321_s1 = sld [smem:[#allocation9 + $0x480]]  ;;  %v286_v54 = vstv %s254_s4  ;;  %v707_v59 = vpop.eup %706  ;;  %v425_v0 = vmul.f32 %v705_v13, %v424_v53  ;;  %v428_v3 = vmul.f32 %v705_v13, %v427_v58  ;;  %s560_s22 = sshll.u32 %s829_s11, 4  ;;  %s561_s22 = int_to_ptr.vmem [resolvable:$true] %s560_s22 }
 0x10f   :  { %s1491_s26 = ssub.f32 0.0, %s1269_s7  ;;  %v287_v36 = vadd.f32 %v286_v54, %v285_v17  ;;  %v290_v33 = vstv %s256_s20  ;;  %v709_v1 = vpop.eup %708  ;;  %v448_v40 = vmul.f32 %v707_v59, %v447_v63  ;;  %v451_v10 = vmul.f32 %v707_v59, %v450_v22  ;;  %s792_s27 = scalar_lea.vmem %s561_s22, 256 }
 0x110   :  { %s1327_s16 = sld [smem:[#allocation9 + $0x481]]  ;;  %v291_v37 = vadd.f32 %v290_v33, %v289_v12  ;;  %v711_v7 = vpop.eup %710  ;;  %p793_p11 = scmp.ne.s32.totalorder %s561_s22, %s792_s27 }
 0x111   :  { %v358_v35 = vstv %s1491_s26  ;;  %s1329_s6 = sld [smem:[#allocation9 + $0x500]]  ;;  %v311_v38 = vadd.f32 %v310_v26, %v287_v36  ;;  %p797_p12 = scmp.lt.s32.totalorder %s561_s22, %s561_s22 }
 0x112   :  { %s1492_s24 = ssub.f32 0.0, %s1271_s3  ;;  %v314_v47 = vadd.f32 %v313_v32, %v291_v37  ;;  %v359_v49 = vmul.f32 %v699_v30, %v358_v35  ;;  %v713_v45 = vpop.eup %712  ;;  %p798_p13 = scmp.lt.s32.totalorder %s792_s27, %s792_s27 }
 0x113   :  { %s1333_s19 = sld [smem:[#allocation9 + $0x501]]  ;;  %v334_v15 = vadd.f32 %v333_v31, %v311_v38 }
 0x114   :  { %v378_v43 = vstv %s1492_s24  ;;  %s1493_s12 = ssub.f32 0.0, %s1273_s10  ;;  %v337_v60 = vadd.f32 %v336_v41, %v314_v47  ;;  %v715_v29 = vpop.eup %714  ;;  %p799_p0 = por %p798_p13, %p797_p12 }
 0x115   :  { %s1337_s17 = sld [smem:[#allocation9 + $0x580]]  ;;  %v379_v50 = vmul.f32 %v701_v55, %v378_v43  ;;  %v357_v5 = vadd.f32 %v356_v42, %v334_v15 }
 0x116   :  { %v381_v56 = vstv %s1493_s12  ;;  %s1494_s13 = ssub.f32 0.0, %s1275_s23  ;;  %v360_v61 = vadd.f32 %v359_v49, %v337_v60  ;;  %p800_p1 = pnand %p799_p0, %p793_p11 }
 0x117   :  { %s1341_s7 = sld [smem:[#allocation9 + $0x581]]  ;;  %v382_v52 = vmul.f32 %v701_v55, %v381_v56  ;;  %v380_v39 = vadd.f32 %v379_v50, %v357_v5 }
 0x118   :  { %v401_v48 = vstv %s1494_s13  ;;  %s1495_s3 = ssub.f32 0.0, %s1277_s30 }
 0x119   :  { %s238_s10 = ssub.f32 0.0, %s1295_s9  ;;  %v402_v57 = vmul.f32 %v703_v44, %v401_v48  ;;  %v383_v2 = vadd.f32 %v382_v52, %v360_v61 }
 0x11a   :  { %v404_v51 = vstv %s1495_s3  ;;  %s240_s5 = ssub.f32 0.0, %s1297_s18 }
 0x11b   :  { %s242_s23 = ssub.f32 0.0, %s1321_s1  ;;  %v405_v62 = vmul.f32 %v703_v44, %v404_v51  ;;  %v470_v4 = vstv %s238_s10  ;;  %v403_v6 = vadd.f32 %v402_v57, %v380_v39 }
 0x11c   :  { %s244_s30 = ssub.f32 0.0, %s1327_s16  ;;  %v473_v23 = vstv %s240_s5  ;;  %v471_v16 = vmul.f32 %v709_v1, %v470_v4 }
 0x11d   :  { %s246_s28 = ssub.f32 0.0, %s1329_s6  ;;  %v406_v9 = vadd.f32 %v405_v62, %v383_v2  ;;  %v493_v11 = vstv %s242_s23  ;;  %v426_v14 = vadd.f32 %v425_v0, %v403_v6  ;;  %v474_v27 = vmul.f32 %v709_v1, %v473_v23 }
 0x11e   :  { %s248_s15 = ssub.f32 0.0, %s1333_s19  ;;  %v496_v8 = vstv %s244_s30  ;;  %v494_v17 = vmul.f32 %v711_v7, %v493_v11 }
 0x11f   :  { %s250_s0 = ssub.f32 0.0, %s1337_s17  ;;  %v429_v19 = vadd.f32 %v428_v3, %v406_v9  ;;  %v516_v20 = vstv %s246_s28  ;;  %v449_v21 = vadd.f32 %v448_v40, %v426_v14  ;;  %v497_v12 = vmul.f32 %v711_v7, %v496_v8 }
 0x120   :  { %s252_s2 = ssub.f32 0.0, %s1341_s7  ;;  %v519_v46 = vstv %s248_s15  ;;  %v517_v18 = vmul.f32 %v713_v45, %v516_v20 }
 0x121   :  { %v452_v24 = vadd.f32 %v451_v10, %v429_v19  ;;  %v539_v25 = vstv %s250_s0  ;;  %v472_v26 = vadd.f32 %v471_v16, %v449_v21  ;;  %v520_v54 = vmul.f32 %v713_v45, %v519_v46 }
 0x122   :  { %v542_v28 = vstv %s252_s2  ;;  %v540_v34 = vmul.f32 %v715_v29, %v539_v25 }
 0x123   :  { %v475_v30 = vadd.f32 %v474_v27, %v452_v24  ;;  %v495_v32 = vadd.f32 %v494_v17, %v472_v26  ;;  %v543_v36 = vmul.f32 %v715_v29, %v542_v28 }
 0x125   :  { %v498_v35 = vadd.f32 %v497_v12, %v475_v30  ;;  %v518_v33 = vadd.f32 %v517_v18, %v495_v32 }
 0x127   :  { %v521_v31 = vadd.f32 %v520_v54, %v498_v35  ;;  %v541_v55 = vadd.f32 %v540_v34, %v518_v33 }
 0x129   :  { %v544_v37 = vadd.f32 %v543_v36, %v521_v31  ;;  %v545_v41 = vmul.f32 1.442695, %v541_v55 }
 0x12b   :  { %v549_v43 = vmul.f32 1.442695, %v544_v37  ;;  %716 = vpow2.f32 %v545_v41 }
 0x12d   :  { %718 = vpow2.f32 %v549_v43 }
 0x138   :  { %v717_v38 = vpop.eup %716 }
 0x139   :  { %v547_v56 = vadd.f32 1.0, %v717_v38 }
 0x13a   :  { %v719_v42 = vpop.eup %718 }
 0x13b   :  { %v551_v44 = vadd.f32 1.0, %v719_v42  ;;  %720 = vrcp.f32 %v547_v56 }
 0x13d   :  { %722 = vrcp.f32 %v551_v44 }
 0x148   :  { %v721_v47 = vpop.eup %720 }
 0x149   :  { %553 = vst [vmem:[#allocation12] sm:$0xff] %v721_v47 }
 0x14a   :  { %v723_v49 = vpop.eup %722 }
 0x14b   :  { %554 = vst [vmem:[#allocation12 + $0x8] sm:$0xff] %v723_v49 }
 0x14c   :  { %803 = shalt.err (!%p800_p1)
}
 0x14d   :  { %s1496_s21 = smov 8   ;;  %s1497_s25 = smov 128  }
 0x14e   :  { %s1498_s9 = sld [smem:[#allocation43_spill]] }
 0x154   :  { %566 = dma.vmem_to_hbm [thread:$0]  %s561_s22, 256, %s1498_s9, [#allocation4], %s1497_s25, %s1497_s25, %s1496_s21  }
 0x155   :  { %820 = dma.done.wait [#allocation4], 256  }
 0x156   :  { %821 = vsyncadd [#allocation4], 4294967040 }
 0x157   :  { %570 = vsyncpa [#allocation3], 1 }
 0x158   :  { %571 = vsyncpa [#allocation4], 1 }
 0x159   :  { %572 = vsyncpa [#allocation5], 1 }
 0x15a   :  { %573 = vsyncpa [#allocation8], 1 }
 0x15b   :  { %574 = vsyncpa [#allocation11], 1 }

</bundles_post_ra>
